<compile_context>
chip_gen: v7x
topology: tpu7x:2x2x1
jax: 0.10.0
libtpu: 0.0.40
codegen_flags: <defaults>
</compile_context>

<pallas_src>
import math
import functools

import jax
import jax.numpy as jnp
from jax.experimental import pallas as pl
from jax.experimental.pallas import tpu as pltpu


# --------------------------------------------------------------------------
# Kernel: one (batch-tile, encoder-layer) step per grid point.
# --------------------------------------------------------------------------
def _rta_kernel(mat_ref, matcol_ref, thickcol_ref, pe_ref, embstack_ref,
                wqkv_ref, bqkv_ref, wo_ref, bo_ref,
                ln1g_ref, ln1b_ref, ln2g_ref, ln2b_ref,
                w1_ref, b1_ref, w2_ref, b2_ref,
                ohw1_ref, ohb1_ref, ohw2_ref, ohb2_ref,
                out_ref, x_ref, *, pad_idx, num_heads):
    f32 = jnp.float32
    bf16 = jnp.bfloat16

    layer = pl.program_id(1)
    n_layers = pl.num_programs(1)

    _, TB, S = mat_ref.shape
    TBS = TB * S
    E = pe_ref.shape[1]
    H = num_heads
    Dh = E // H
    W = out_ref.shape[2] // 3

    mat = mat_ref[0]                                     # (TB, S) int32

    # ---- first layer step: embedding + thickness Linear(1,E) + PE ----------
    @pl.when(layer == 0)
    def _():
        VP2 = embstack_ref.shape[0]                      # vocab + 2 folded rows
        NV = VP2 - 2
        matc = matcol_ref[0]                             # (TBS, 1) int32
        thic = thickcol_ref[0]                           # (TBS, 1) f32
        lane = jax.lax.broadcasted_iota(jnp.int32, (TBS, VP2), 1)
        combined = ((lane == matc).astype(f32)
                    + jnp.where(lane == NV, thic, 0.0)   # thickness column
                    + (lane == NV + 1).astype(f32))      # ones column -> bias
        # tiny (TBS, V+2) x (V+2, E) matmul; kept f32 to preserve thickness
        emb = jnp.dot(combined, embstack_ref[...], preferred_element_type=f32)
        emb = emb.reshape(TB, S, E) + pe_ref[...][None]  # broadcast PE over TB
        x_ref[...] = emb.reshape(TBS, E)

    # ---- one encoder layer (post-LN) ---------------------------------------
    x = x_ref[...]                                       # (TBS, E) f32
    mask = jnp.where(mat == pad_idx, -1e30, 0.0).astype(f32).reshape(TB, 1, S)

    def layer_norm(y, g, b):
        mu = jnp.mean(y, axis=-1, keepdims=True)
        var = jnp.mean(jnp.square(y - mu), axis=-1, keepdims=True)
        return (y - mu) * jax.lax.rsqrt(var + 1e-5) * g + b

    scale = 1.0 / math.sqrt(Dh)

    qkv = (jnp.dot(x.astype(bf16), wqkv_ref[0], preferred_element_type=f32)
           + bqkv_ref[0])                                # (TBS, 3E) f32
    q3 = qkv[:, 0:E].reshape(TB, S, E)
    k3 = qkv[:, E:2 * E].reshape(TB, S, E)
    v3 = qkv[:, 2 * E:3 * E].reshape(TB, S, E)

    ctx_heads = []
    for h in range(H):                                   # H small, static
        sl = slice(h * Dh, (h + 1) * Dh)
        qh = q3[:, :, sl].astype(bf16)
        kh = k3[:, :, sl].astype(bf16)
        vh = v3[:, :, sl].astype(bf16)
        s = (jnp.einsum('bqd,bkd->bqk', qh, kh, preferred_element_type=f32)
             * scale + mask)                             # (TB, S, S)
        m = jnp.max(s, axis=-1, keepdims=True)
        p = jnp.exp(s - m)
        denom = jnp.sum(p, axis=-1, keepdims=True)
        oh = jnp.einsum('bqk,bkd->bqd', p.astype(bf16), vh,
                        preferred_element_type=f32)      # (TB, S, Dh)
        # normalize the small (S, Dh) context, not the (S, S) probabilities
        oh = oh * pl.reciprocal(denom, approx=False)
        ctx_heads.append(oh)
    # lane-assemble the heads (all inside the first 128-lane tile) and do a
    # single K=E output projection instead of H small K=Dh matmuls.
    ctx = jnp.concatenate(ctx_heads, axis=-1).reshape(TBS, E)
    attn = (jnp.dot(ctx.astype(bf16), wo_ref[0], preferred_element_type=f32)
            + bo_ref[0])

    x = layer_norm(x + attn, ln1g_ref[0], ln1b_ref[0])

    hmid = (jnp.dot(x.astype(bf16), w1_ref[0], preferred_element_type=f32)
            + b1_ref[0])
    hmid = jnp.maximum(hmid, 0.0)
    ff = (jnp.dot(hmid.astype(bf16), w2_ref[0], preferred_element_type=f32)
          + b2_ref[0])
    x = layer_norm(x + ff, ln2g_ref[0], ln2b_ref[0])
    x_ref[...] = x

    # ---- last layer step: masked-mean pooling + output head + softmax ------
    @pl.when(layer == n_layers - 1)
    def _():
        count = jnp.sum((mat != pad_idx).astype(f32), axis=-1, keepdims=True)
        pooled = jnp.sum(x.reshape(TB, S, E), axis=1) / count        # (TB, E)
        hh = (jnp.dot(pooled.astype(bf16), ohw1_ref[...],
                      preferred_element_type=f32) + ohb1_ref[...])
        hh = jnp.maximum(hh, 0.0)
        logits = (jnp.dot(hh.astype(bf16), ohw2_ref[...],
                          preferred_element_type=f32) + ohb2_ref[...])
        # class-major columns: [c0 | c1 | c2], each W wide
        l0, l1, l2 = logits[:, 0:W], logits[:, W:2 * W], logits[:, 2 * W:3 * W]
        mx = jnp.maximum(jnp.maximum(l0, l1), l2)
        e0, e1, e2 = jnp.exp(l0 - mx), jnp.exp(l1 - mx), jnp.exp(l2 - mx)
        r = pl.reciprocal(e0 + e1 + e2, approx=False)
        out_ref[0, :, 0:W] = e0 * r
        out_ref[0, :, W:2 * W] = e1 * r
        out_ref[0, :, 2 * W:3 * W] = e2 * r


# --------------------------------------------------------------------------
# Wrapper
# --------------------------------------------------------------------------
def transformer_rta_forward(materials, thicknesses, params, *,
                            padding_token_idx, num_heads, num_wavelengths,
                            batch_tile=None):
    B, S = materials.shape
    W = num_wavelengths
    TB = batch_tile if batch_tile is not None else B
    assert B % TB == 0, "batch must be divisible by batch_tile"
    NBT = B // TB

    bf16 = jnp.bfloat16
    pe = params["pe"][:S]                                # (S, E)
    E = pe.shape[1]
    L = params["wqkv"].shape[0]
    F = params["w1"].shape[2]

    # batch-tiled inputs: leading tile axis so trailing block dims == full dims
    mat3 = materials.astype(jnp.int32).reshape(NBT, TB, S)
    matcol = materials.astype(jnp.int32).reshape(NBT, TB * S, 1)
    thickcol = thicknesses.astype(jnp.float32).reshape(NBT, TB * S, 1)

    # bf16 matmul operands (biases / LN params / embstack stay f32)
    wqkv = params["wqkv"].astype(bf16)
    wo = params["wo"].astype(bf16)
    w1 = params["w1"].astype(bf16)
    w2 = params["w2"].astype(bf16)
    ohw1 = params["ohw1"].astype(bf16)
    ohw2 = params["ohw2"].astype(bf16)

    in_specs = [
        pl.BlockSpec((1, TB, S), lambda b, l: (b, 0, 0)),       # materials
        pl.BlockSpec((1, TB * S, 1), lambda b, l: (b, 0, 0)),   # materials col
        pl.BlockSpec((1, TB * S, 1), lambda b, l: (b, 0, 0)),   # thickness col
        pl.BlockSpec((S, E), lambda b, l: (0, 0)),              # pe
        pl.BlockSpec(params["embstack"].shape, lambda b, l: (0, 0)),
        pl.BlockSpec((1, E, 3 * E), lambda b, l: (l, 0, 0)),    # wqkv
        pl.BlockSpec((1, 1, 3 * E), lambda b, l: (l, 0, 0)),    # bqkv
        pl.BlockSpec((1, E, E), lambda b, l: (l, 0, 0)),        # wo
        pl.BlockSpec((1, 1, E), lambda b, l: (l, 0, 0)),        # bo
        pl.BlockSpec((1, 1, E), lambda b, l: (l, 0, 0)),        # ln1g
        pl.BlockSpec((1, 1, E), lambda b, l: (l, 0, 0)),        # ln1b
        pl.BlockSpec((1, 1, E), lambda b, l: (l, 0, 0)),        # ln2g
        pl.BlockSpec((1, 1, E), lambda b, l: (l, 0, 0)),        # ln2b
        pl.BlockSpec((1, E, F), lambda b, l: (l, 0, 0)),        # w1
        pl.BlockSpec((1, 1, F), lambda b, l: (l, 0, 0)),        # b1
        pl.BlockSpec((1, F, E), lambda b, l: (l, 0, 0)),        # w2
        pl.BlockSpec((1, 1, E), lambda b, l: (l, 0, 0)),        # b2
        pl.BlockSpec((E, F), lambda b, l: (0, 0)),              # ohw1
        pl.BlockSpec((1, F), lambda b, l: (0, 0)),              # ohb1
        pl.BlockSpec((F, 3 * W), lambda b, l: (0, 0)),          # ohw2
        pl.BlockSpec((1, 3 * W), lambda b, l: (0, 0)),          # ohb2
    ]

    kernel = functools.partial(_rta_kernel,
                               pad_idx=padding_token_idx,
                               num_heads=num_heads)

    out = pl.pallas_call(
        kernel,
        out_shape=jax.ShapeDtypeStruct((NBT, TB, 3 * W), jnp.float32),
        grid_spec=pltpu.PrefetchScalarGridSpec(
            num_scalar_prefetch=0,
            grid=(NBT, L),                       # layers innermost (carry in x)
            in_specs=in_specs,
            out_specs=pl.BlockSpec((1, TB, 3 * W), lambda b, l: (b, 0, 0)),
            scratch_shapes=[pltpu.VMEM((TB * S, E), jnp.float32)],
        ),
        compiler_params=pltpu.CompilerParams(
            dimension_semantics=("parallel", "arbitrary"),
            vmem_limit_bytes=32 * 1024 * 1024),
    )(mat3, matcol, thickcol, pe, params["embstack"],
      wqkv, params["bqkv"], wo, params["bo"],
      params["ln1g"], params["ln1b"], params["ln2g"], params["ln2b"],
      w1, params["b1"], w2, params["b2"],
      ohw1, params["ohb1"], ohw2, params["ohb2"])

    # glue: class-major (B, 3W) -> (B, W, 3) to match torch's .view + softmax
    return jnp.transpose(out.reshape(B, 3, W), (0, 2, 1))


# --------------------------------------------------------------------------
# Pure-JAX reference (same assumed EncoderBlock), for correctness check.
# --------------------------------------------------------------------------
def _reference_forward(materials, thicknesses, params, *,
                       padding_token_idx, num_heads, num_wavelengths):
    B, S = materials.shape
    emb, tew, teb = params["emb"], params["tew"], params["teb"]
    E = emb.shape[1]
    H = num_heads
    Dh = E // H

    x = (emb[materials] + thicknesses[..., None] * tew + teb
         + params["pe"][:S][None])
    mask = jnp.where(materials == padding_token_idx, -1e30,
                     0.0)[:, None, None, :]

    def ln(y, g, b):
        mu = y.mean(-1, keepdims=True)
        var = ((y - mu) ** 2).mean(-1, keepdims=True)
        return (y - mu) / jnp.sqrt(var + 1e-5) * g + b

    L = params["wqkv"].shape[0]
    for l in range(L):
        qkv = x @ params["wqkv"][l] + params["bqkv"][l]
        q, k, v = jnp.split(qkv, 3, axis=-1)
        q = q.reshape(B, S, H, Dh).transpose(0, 2, 1, 3)
        k = k.reshape(B, S, H, Dh).transpose(0, 2, 1, 3)
        v = v.reshape(B, S, H, Dh).transpose(0, 2, 1, 3)
        s = q @ k.transpose(0, 1, 3, 2) / math.sqrt(Dh) + mask
        p = jax.nn.softmax(s, axis=-1)
        o = (p @ v).transpose(0, 2, 1, 3).reshape(B, S, E)
        attn = o @ params["wo"][l] + params["bo"][l]
        x = ln(x + attn, params["ln1g"][l], params["ln1b"][l])
        ff = (jnp.maximum(x @ params["w1"][l] + params["b1"][l], 0.0)
              @ params["w2"][l] + params["b2"][l])
        x = ln(x + ff, params["ln2g"][l], params["ln2b"][l])

    count = (materials != padding_token_idx).sum(-1, keepdims=True)
    pooled = x.sum(1) / count.astype(jnp.float32)
    h = jnp.maximum(pooled @ params["ohw1"] + params["ohb1"], 0.0)
    flat = h @ params["ohw2_flat"] + params["ohb2_flat"]
    return jax.nn.softmax(flat.reshape(B, num_wavelengths, 3), axis=-1)


# --------------------------------------------------------------------------
# Deterministic parameter construction (synthetic; no checkpoint loading)
# --------------------------------------------------------------------------
def make_params(key, *, num_materials, E, F, L, W, max_seq_len):
    NV = num_materials + 1
    keys = iter(jax.random.split(key, 24))

    def rnd(shape, scale=0.2):
        return jax.random.normal(next(keys), shape, dtype=jnp.float32) * scale

    emb = rnd((NV, E))
    tew = rnd((1, E))                       # Linear(1, E) weight as a row
    teb = rnd((1, E))
    ow2 = rnd((F, 3 * W), scale=0.4)        # torch column order: w*3 + c
    ob2 = rnd((1, 3 * W), scale=0.4)

    params = {
        "emb": emb, "tew": tew, "teb": teb,
        "embstack": jnp.concatenate([emb, tew, teb], axis=0),     # (NV+2, E)
        "wqkv": rnd((L, E, 3 * E)), "bqkv": rnd((L, 1, 3 * E)),
        "wo": rnd((L, E, E)), "bo": rnd((L, 1, E)),
        "ln1g": 1.0 + rnd((L, 1, E), 0.05), "ln1b": rnd((L, 1, E), 0.05),
        "ln2g": 1.0 + rnd((L, 1, E), 0.05), "ln2b": rnd((L, 1, E), 0.05),
        "w1": rnd((L, E, F)), "b1": rnd((L, 1, F)),
        "w2": rnd((L, F, E)), "b2": rnd((L, 1, E)),
        "ohw1": rnd((E, F)), "ohb1": rnd((1, F)),
        "ohw2_flat": ow2, "ohb2_flat": ob2,
        # class-major reorder: new column c*W + w  <-  torch column w*3 + c
        "ohw2": jnp.transpose(ow2.reshape(F, W, 3), (0, 2, 1)).reshape(F, 3 * W),
        "ohb2": jnp.transpose(ob2.reshape(W, 3), (1, 0)).reshape(1, 3 * W),
    }

    # sinusoidal positional encodings (max_seq_len, E)
    position = jnp.arange(max_seq_len, dtype=jnp.float32)[:, None]
    div_term = jnp.exp(jnp.arange(0, E, 2, dtype=jnp.float32)
                       * (-math.log(10000.0) / E))
    pe = jnp.zeros((max_seq_len, E), jnp.float32)
    pe = pe.at[:, 0::2].set(jnp.sin(position * div_term))
    pe = pe.at[:, 1::2].set(jnp.cos(position * div_term[: E // 2]))
    params["pe"] = pe
    return params


if __name__ == "__main__":
    NUM_MATERIALS = 6
    EMBED = 32
    PAD_IDX = 0
    NUM_HEADS = 4
    FF_HIDDEN = 64
    NUM_LAYERS = 2
    NUM_WAVELENGTHS = 8
    MAX_SEQ = 32
    B, S = 4, 8
    BATCH_TILE = 2                      # grid = (2 batch tiles, 2 layers)

    key = jax.random.PRNGKey(0)
    k_mat, k_thick, k_params = jax.random.split(key, 3)

    materials = jax.random.randint(k_mat, (B, S), 1, NUM_MATERIALS + 1,
                                   dtype=jnp.int32)
    materials = materials.at[1, 5:].set(PAD_IDX)     # padding in row 1
    materials = materials.at[3, 6:].set(PAD_IDX)     # padding in row 3
    thicknesses = jax.random.uniform(k_thick, (B, S), dtype=jnp.float32)

    params = make_params(k_params, num_materials=NUM_MATERIALS, E=EMBED,
                         F=FF_HIDDEN, L=NUM_LAYERS, W=NUM_WAVELENGTHS,
                         max_seq_len=MAX_SEQ)

    # embstack fold is only valid while material ids stay < num_materials + 1
    assert int(jnp.max(materials)) <= NUM_MATERIALS

    rta = transformer_rta_forward(
        materials, thicknesses, params,
        padding_token_idx=PAD_IDX, num_heads=NUM_HEADS,
        num_wavelengths=NUM_WAVELENGTHS, batch_tile=BATCH_TILE)
    rta = jax.block_until_ready(rta)

    # reference uses the same bf16-rounded matmul weights (f32 math) so the
    # comparison isolates kernel structure from weight quantization.
    ref_params = dict(params)
    for name in ["wqkv", "wo", "w1", "w2", "ohw1", "ohw2_flat"]:
        ref_params[name] = params[name].astype(jnp.bfloat16).astype(jnp.float32)
    ref = _reference_forward(
        materials, thicknesses, ref_params,
        padding_token_idx=PAD_IDX, num_heads=NUM_HEADS,
        num_wavelengths=NUM_WAVELENGTHS)

    assert rta.shape == (B, NUM_WAVELENGTHS, 3)
    assert bool(jnp.all(jnp.isfinite(rta)))
    # softmax rows sum to 1
    assert bool(jnp.allclose(jnp.sum(rta, axis=-1), 1.0, atol=1e-5))
    # matches the pure-JAX reference (tolerance covers bf16 activation casts)
    assert bool(jnp.allclose(rta, ref, atol=3e-2)), \
        float(jnp.max(jnp.abs(rta - ref)))
    print("KERNEL_OK")
</pallas_src>

<mosaic_0001>
module attributes {stable_mosaic.version = 11 : i64} {
  func.func @_rta_kernel(%arg0: i32, %arg1: i32, %arg2: memref<1x2x8xi32, #tpu.memory_space<vmem>>, %arg3: memref<1x16x1xi32, #tpu.memory_space<vmem>>, %arg4: memref<1x16x1xf32, #tpu.memory_space<vmem>>, %arg5: memref<8x32xf32, #tpu.memory_space<vmem>>, %arg6: memref<9x32xf32, #tpu.memory_space<vmem>>, %arg7: memref<1x32x96xbf16, #tpu.memory_space<vmem>>, %arg8: memref<1x1x96xf32, #tpu.memory_space<vmem>>, %arg9: memref<1x32x32xbf16, #tpu.memory_space<vmem>>, %arg10: memref<1x1x32xf32, #tpu.memory_space<vmem>>, %arg11: memref<1x1x32xf32, #tpu.memory_space<vmem>>, %arg12: memref<1x1x32xf32, #tpu.memory_space<vmem>>, %arg13: memref<1x1x32xf32, #tpu.memory_space<vmem>>, %arg14: memref<1x1x32xf32, #tpu.memory_space<vmem>>, %arg15: memref<1x32x64xbf16, #tpu.memory_space<vmem>>, %arg16: memref<1x1x64xf32, #tpu.memory_space<vmem>>, %arg17: memref<1x64x32xbf16, #tpu.memory_space<vmem>>, %arg18: memref<1x1x32xf32, #tpu.memory_space<vmem>>, %arg19: memref<32x64xbf16, #tpu.memory_space<vmem>>, %arg20: memref<1x64xf32, #tpu.memory_space<vmem>>, %arg21: memref<64x24xbf16, #tpu.memory_space<vmem>>, %arg22: memref<1x24xf32, #tpu.memory_space<vmem>>, %arg23: memref<1x2x24xf32, #tpu.memory_space<vmem>>, %arg24: memref<16x32xf32, #tpu.memory_space<vmem>>) attributes {dimension_semantics = [#tpu.dimension_semantics<parallel>, #tpu.dimension_semantics<arbitrary>], iteration_bounds = array<i64: 2, 2>, scalar_prefetch = 0 : i64, scratch_operands = 1 : i64, tpu.core_type = #tpu.core_type<tc>, window_params = [{transform_indices = @transform_0, window_bounds = array<i64: 1, 2, 8>}, {transform_indices = @transform_1, window_bounds = array<i64: 1, 16, 1>}, {transform_indices = @transform_2, window_bounds = array<i64: 1, 16, 1>}, {pipeline_mode = #tpu.pipeline_mode<synchronous>, transform_indices = @transform_3, window_bounds = array<i64: 8, 32>}, {pipeline_mode = #tpu.pipeline_mode<synchronous>, transform_indices = @transform_4, window_bounds = array<i64: 9, 32>}, {transform_indices = @transform_5, window_bounds = array<i64: 1, 32, 96>}, {transform_indices = @transform_6, window_bounds = array<i64: 1, 1, 96>}, {transform_indices = @transform_7, window_bounds = array<i64: 1, 32, 32>}, {transform_indices = @transform_8, window_bounds = array<i64: 1, 1, 32>}, {transform_indices = @transform_9, window_bounds = array<i64: 1, 1, 32>}, {transform_indices = @transform_10, window_bounds = array<i64: 1, 1, 32>}, {transform_indices = @transform_11, window_bounds = array<i64: 1, 1, 32>}, {transform_indices = @transform_12, window_bounds = array<i64: 1, 1, 32>}, {transform_indices = @transform_13, window_bounds = array<i64: 1, 32, 64>}, {transform_indices = @transform_14, window_bounds = array<i64: 1, 1, 64>}, {transform_indices = @transform_15, window_bounds = array<i64: 1, 64, 32>}, {transform_indices = @transform_16, window_bounds = array<i64: 1, 1, 32>}, {pipeline_mode = #tpu.pipeline_mode<synchronous>, transform_indices = @transform_17, window_bounds = array<i64: 32, 64>}, {pipeline_mode = #tpu.pipeline_mode<synchronous>, transform_indices = @transform_18, window_bounds = array<i64: 1, 64>}, {pipeline_mode = #tpu.pipeline_mode<synchronous>, transform_indices = @transform_19, window_bounds = array<i64: 64, 24>}, {pipeline_mode = #tpu.pipeline_mode<synchronous>, transform_indices = @transform_20, window_bounds = array<i64: 1, 24>}, {transform_indices = @transform_21, window_bounds = array<i64: 1, 2, 24>}]} {
    %c0 = arith.constant 0 : index
    %c0_0 = arith.constant 0 : index
    %c0_1 = arith.constant 0 : index
    %0 = vector.load %arg2[%c0, %c0_0, %c0_1] : memref<1x2x8xi32, #tpu.memory_space<vmem>>, vector<1x2x8xi32>
    %1 = vector.shape_cast %0 : vector<1x2x8xi32> to vector<2x8xi32>
    %c0_i32 = arith.constant 0 : i32
    %2 = arith.cmpi eq, %arg1, %c0_i32 : i32
    %3 = arith.extui %2 : i1 to i32
    %c0_i32_2 = arith.constant 0 : i32
    %4 = arith.cmpi ne, %3, %c0_i32_2 : i32
    scf.if %4 {
      %c0_81 = arith.constant 0 : index
      %c0_82 = arith.constant 0 : index
      %c0_83 = arith.constant 0 : index
      %204 = vector.load %arg3[%c0_81, %c0_82, %c0_83] : memref<1x16x1xi32, #tpu.memory_space<vmem>>, vector<1x16x1xi32>
      %205 = vector.shape_cast %204 : vector<1x16x1xi32> to vector<16x1xi32>
      %c0_84 = arith.constant 0 : index
      %c0_85 = arith.constant 0 : index
      %c0_86 = arith.constant 0 : index
      %206 = vector.load %arg4[%c0_84, %c0_85, %c0_86] : memref<1x16x1xf32, #tpu.memory_space<vmem>>, vector<1x16x1xf32>
      %207 = vector.shape_cast %206 : vector<1x16x1xf32> to vector<16x1xf32>
      %208 = tpu.iota {dimensions = array<i32: 1>} : vector<16x9xi32>
      %209 = vector.broadcast %205 : vector<16x1xi32> to vector<16x9xi32>
      %210 = arith.cmpi eq, %208, %209 : vector<16x9xi32>
      %211 = arith.extui %210 : vector<16x9xi1> to vector<16x9xi32>
      %212 = arith.sitofp %211 : vector<16x9xi32> to vector<16x9xf32>
      %c7_i32 = arith.constant 7 : i32
      %213 = vector.broadcast %c7_i32 : i32 to vector<16x9xi32>
      %214 = arith.cmpi eq, %208, %213 : vector<16x9xi32>
      %cst_87 = arith.constant 0.000000e+00 : f32
      %215 = vector.shape_cast %207 : vector<16x1xf32> to vector<16x1xf32>
      %216 = vector.broadcast %215 : vector<16x1xf32> to vector<16x9xf32>
      %217 = vector.broadcast %cst_87 : f32 to vector<16x9xf32>
      %218 = arith.select %214, %216, %217 : vector<16x9xi1>, vector<16x9xf32>
      %219 = arith.addf %212, %218 : vector<16x9xf32>
      %c8_i32 = arith.constant 8 : i32
      %220 = vector.broadcast %c8_i32 : i32 to vector<16x9xi32>
      %221 = arith.cmpi eq, %208, %220 : vector<16x9xi32>
      %222 = arith.extui %221 : vector<16x9xi1> to vector<16x9xi32>
      %223 = arith.sitofp %222 : vector<16x9xi32> to vector<16x9xf32>
      %224 = arith.addf %219, %223 : vector<16x9xf32>
      %c0_88 = arith.constant 0 : index
      %c0_89 = arith.constant 0 : index
      %225 = vector.load %arg6[%c0_88, %c0_89] : memref<9x32xf32, #tpu.memory_space<vmem>>, vector<9x32xf32>
      %cst_90 = arith.constant dense<0.000000e+00> : vector<16x32xf32>
      %226 = tpu.matmul %224, %225, %cst_90 {dimension_numbers = #tpu.dot_dimension_numbers<[1], [0], [0], [1], [0, 0, 1, 1], [], []>} : vector<16x9xf32>, vector<9x32xf32>, vector<16x32xf32> -> vector<16x32xf32>
      %227 = vector.shape_cast %226 : vector<16x32xf32> to vector<2x8x32xf32>
      %c0_91 = arith.constant 0 : index
      %c0_92 = arith.constant 0 : index
      %228 = vector.load %arg5[%c0_91, %c0_92] : memref<8x32xf32, #tpu.memory_space<vmem>>, vector<8x32xf32>
      %229 = vector.shape_cast %228 : vector<8x32xf32> to vector<1x8x32xf32>
      %230 = vector.broadcast %229 : vector<1x8x32xf32> to vector<2x8x32xf32>
      %231 = arith.addf %227, %230 : vector<2x8x32xf32>
      %232 = vector.shape_cast %231 : vector<2x8x32xf32> to vector<16x32xf32>
      %c0_93 = arith.constant 0 : index
      %c0_94 = arith.constant 0 : index
      %233 = vector.load %arg24[%c0_93, %c0_94] : memref<16x32xf32, #tpu.memory_space<vmem>>, vector<16x32xf32>
      tpu.vector_store %arg24[%c0_93, %c0_94], %232 {strides = array<i32>} : memref<16x32xf32, #tpu.memory_space<vmem>>, vector<16x32xf32>,
    } else {
    }
    %c0_3 = arith.constant 0 : index
    %c0_4 = arith.constant 0 : index
    %5 = vector.load %arg24[%c0_3, %c0_4] : memref<16x32xf32, #tpu.memory_space<vmem>>, vector<16x32xf32>
    %c0_i32_5 = arith.constant 0 : i32
    %6 = vector.broadcast %c0_i32_5 : i32 to vector<2x8xi32>
    %7 = arith.cmpi eq, %1, %6 : vector<2x8xi32>
    %cst = arith.constant -1.000000e+30 : f32
    %cst_6 = arith.constant 0.000000e+00 : f32
    %8 = vector.broadcast %cst : f32 to vector<2x8xf32>
    %9 = vector.broadcast %cst_6 : f32 to vector<2x8xf32>
    %10 = arith.select %7, %8, %9 : vector<2x8xi1>, vector<2x8xf32>
    %11 = vector.shape_cast %10 : vector<2x8xf32> to vector<2x1x8xf32>
    %12 = arith.truncf %5 : vector<16x32xf32> to vector<16x32xbf16>
    %c0_7 = arith.constant 0 : index
    %c0_8 = arith.constant 0 : index
    %c0_9 = arith.constant 0 : index
    %13 = vector.load %arg7[%c0_7, %c0_8, %c0_9] : memref<1x32x96xbf16, #tpu.memory_space<vmem>>, vector<1x32x96xbf16>
    %14 = vector.shape_cast %13 : vector<1x32x96xbf16> to vector<32x96xbf16>
    %cst_10 = arith.constant dense<0.000000e+00> : vector<16x96xf32>
    %15 = tpu.matmul %12, %14, %cst_10 {dimension_numbers = #tpu.dot_dimension_numbers<[1], [0], [0], [1], [0, 0, 1, 1], [], []>} : vector<16x32xbf16>, vector<32x96xbf16>, vector<16x96xf32> -> vector<16x96xf32>
    %c0_11 = arith.constant 0 : index
    %c0_12 = arith.constant 0 : index
    %c0_13 = arith.constant 0 : index
    %16 = vector.load %arg8[%c0_11, %c0_12, %c0_13] : memref<1x1x96xf32, #tpu.memory_space<vmem>>, vector<1x1x96xf32>
    %17 = vector.shape_cast %16 : vector<1x1x96xf32> to vector<1x96xf32>
    %18 = vector.broadcast %17 : vector<1x96xf32> to vector<16x96xf32>
    %19 = arith.addf %15, %18 : vector<16x96xf32>
    %20 = vector.extract_strided_slice %19 {offsets = [0, 0], sizes = [16, 32], strides = [1, 1]} : vector<16x96xf32> to vector<16x32xf32>
    %21 = vector.shape_cast %20 : vector<16x32xf32> to vector<2x8x32xf32>
    %22 = vector.extract_strided_slice %19 {offsets = [0, 32], sizes = [16, 32], strides = [1, 1]} : vector<16x96xf32> to vector<16x32xf32>
    %23 = vector.shape_cast %22 : vector<16x32xf32> to vector<2x8x32xf32>
    %24 = vector.extract_strided_slice %19 {offsets = [0, 64], sizes = [16, 32], strides = [1, 1]} : vector<16x96xf32> to vector<16x32xf32>
    %25 = vector.shape_cast %24 : vector<16x32xf32> to vector<2x8x32xf32>
    %26 = vector.extract_strided_slice %21 {offsets = [0, 0, 0], sizes = [2, 8, 8], strides = [1, 1, 1]} : vector<2x8x32xf32> to vector<2x8x8xf32>
    %27 = arith.truncf %26 : vector<2x8x8xf32> to vector<2x8x8xbf16>
    %28 = vector.extract_strided_slice %23 {offsets = [0, 0, 0], sizes = [2, 8, 8], strides = [1, 1, 1]} : vector<2x8x32xf32> to vector<2x8x8xf32>
    %29 = arith.truncf %28 : vector<2x8x8xf32> to vector<2x8x8xbf16>
    %30 = vector.extract_strided_slice %25 {offsets = [0, 0, 0], sizes = [2, 8, 8], strides = [1, 1, 1]} : vector<2x8x32xf32> to vector<2x8x8xf32>
    %31 = arith.truncf %30 : vector<2x8x8xf32> to vector<2x8x8xbf16>
    "tpu.trace_start"() <{level = 10 : i32, message = "bqd,bkd->bqk"}> : () -> ()
    %cst_14 = arith.constant dense<0.000000e+00> : vector<2x8x8xf32>
    %32 = tpu.matmul %27, %29, %cst_14 {dimension_numbers = #tpu.dot_dimension_numbers<[2], [2], [1], [1], [0, 0, 0, 1, 1, 1], [0], [0]>} : vector<2x8x8xbf16>, vector<2x8x8xbf16>, vector<2x8x8xf32> -> vector<2x8x8xf32>
    "tpu.trace_stop"() : () -> ()
    %cst_15 = arith.constant 0.353553385 : f32
    %33 = vector.broadcast %cst_15 : f32 to vector<2x8x8xf32>
    %34 = arith.mulf %32, %33 : vector<2x8x8xf32>
    %35 = vector.broadcast %11 : vector<2x1x8xf32> to vector<2x8x8xf32>
    %36 = arith.addf %34, %35 : vector<2x8x8xf32>
    %cst_16 = arith.constant dense<0xFF800000> : vector<2x8xf32>
    %37 = vector.multi_reduction <maximumf>, %36, %cst_16 [2] : vector<2x8x8xf32> to vector<2x8xf32>
    %38 = vector.shape_cast %37 : vector<2x8xf32> to vector<2x8x1xf32>
    %39 = vector.broadcast %38 : vector<2x8x1xf32> to vector<2x8x8xf32>
    %40 = arith.subf %36, %39 : vector<2x8x8xf32>
    %41 = math.exp %40 : vector<2x8x8xf32>
    %cst_17 = arith.constant dense<0.000000e+00> : vector<2x8xf32>
    %42 = vector.multi_reduction <add>, %41, %cst_17 [2] : vector<2x8x8xf32> to vector<2x8xf32>
    %43 = vector.shape_cast %42 : vector<2x8xf32> to vector<2x8x1xf32>
    %44 = arith.truncf %41 : vector<2x8x8xf32> to vector<2x8x8xbf16>
    "tpu.trace_start"() <{level = 10 : i32, message = "bqk,bkd->bqd"}> : () -> ()
    %cst_18 = arith.constant dense<0.000000e+00> : vector<2x8x8xf32>
    %45 = tpu.matmul %44, %31, %cst_18 {dimension_numbers = #tpu.dot_dimension_numbers<[2], [1], [1], [2], [0, 0, 0, 1, 1, 2], [0], [0]>} : vector<2x8x8xbf16>, vector<2x8x8xbf16>, vector<2x8x8xf32> -> vector<2x8x8xf32>
    "tpu.trace_stop"() : () -> ()
    %46 = tpu.reciprocal %43 : vector<2x8x1xf32> -> vector<2x8x1xf32>
    %47 = vector.broadcast %46 : vector<2x8x1xf32> to vector<2x8x8xf32>
    %48 = arith.mulf %45, %47 : vector<2x8x8xf32>
    %49 = vector.extract_strided_slice %21 {offsets = [0, 0, 8], sizes = [2, 8, 8], strides = [1, 1, 1]} : vector<2x8x32xf32> to vector<2x8x8xf32>
    %50 = arith.truncf %49 : vector<2x8x8xf32> to vector<2x8x8xbf16>
    %51 = vector.extract_strided_slice %23 {offsets = [0, 0, 8], sizes = [2, 8, 8], strides = [1, 1, 1]} : vector<2x8x32xf32> to vector<2x8x8xf32>
    %52 = arith.truncf %51 : vector<2x8x8xf32> to vector<2x8x8xbf16>
    %53 = vector.extract_strided_slice %25 {offsets = [0, 0, 8], sizes = [2, 8, 8], strides = [1, 1, 1]} : vector<2x8x32xf32> to vector<2x8x8xf32>
    %54 = arith.truncf %53 : vector<2x8x8xf32> to vector<2x8x8xbf16>
    "tpu.trace_start"() <{level = 10 : i32, message = "bqd,bkd->bqk"}> : () -> ()
    %cst_19 = arith.constant dense<0.000000e+00> : vector<2x8x8xf32>
    %55 = tpu.matmul %50, %52, %cst_19 {dimension_numbers = #tpu.dot_dimension_numbers<[2], [2], [1], [1], [0, 0, 0, 1, 1, 1], [0], [0]>} : vector<2x8x8xbf16>, vector<2x8x8xbf16>, vector<2x8x8xf32> -> vector<2x8x8xf32>
    "tpu.trace_stop"() : () -> ()
    %cst_20 = arith.constant 0.353553385 : f32
    %56 = vector.broadcast %cst_20 : f32 to vector<2x8x8xf32>
    %57 = arith.mulf %55, %56 : vector<2x8x8xf32>
    %58 = vector.broadcast %11 : vector<2x1x8xf32> to vector<2x8x8xf32>
    %59 = arith.addf %57, %58 : vector<2x8x8xf32>
    %cst_21 = arith.constant dense<0xFF800000> : vector<2x8xf32>
    %60 = vector.multi_reduction <maximumf>, %59, %cst_21 [2] : vector<2x8x8xf32> to vector<2x8xf32>
    %61 = vector.shape_cast %60 : vector<2x8xf32> to vector<2x8x1xf32>
    %62 = vector.broadcast %61 : vector<2x8x1xf32> to vector<2x8x8xf32>
    %63 = arith.subf %59, %62 : vector<2x8x8xf32>
    %64 = math.exp %63 : vector<2x8x8xf32>
    %cst_22 = arith.constant dense<0.000000e+00> : vector<2x8xf32>
    %65 = vector.multi_reduction <add>, %64, %cst_22 [2] : vector<2x8x8xf32> to vector<2x8xf32>
    %66 = vector.shape_cast %65 : vector<2x8xf32> to vector<2x8x1xf32>
    %67 = arith.truncf %64 : vector<2x8x8xf32> to vector<2x8x8xbf16>
    "tpu.trace_start"() <{level = 10 : i32, message = "bqk,bkd->bqd"}> : () -> ()
    %cst_23 = arith.constant dense<0.000000e+00> : vector<2x8x8xf32>
    %68 = tpu.matmul %67, %54, %cst_23 {dimension_numbers = #tpu.dot_dimension_numbers<[2], [1], [1], [2], [0, 0, 0, 1, 1, 2], [0], [0]>} : vector<2x8x8xbf16>, vector<2x8x8xbf16>, vector<2x8x8xf32> -> vector<2x8x8xf32>
    "tpu.trace_stop"() : () -> ()
    %69 = tpu.reciprocal %66 : vector<2x8x1xf32> -> vector<2x8x1xf32>
    %70 = vector.broadcast %69 : vector<2x8x1xf32> to vector<2x8x8xf32>
    %71 = arith.mulf %68, %70 : vector<2x8x8xf32>
    %72 = vector.extract_strided_slice %21 {offsets = [0, 0, 16], sizes = [2, 8, 8], strides = [1, 1, 1]} : vector<2x8x32xf32> to vector<2x8x8xf32>
    %73 = arith.truncf %72 : vector<2x8x8xf32> to vector<2x8x8xbf16>
    %74 = vector.extract_strided_slice %23 {offsets = [0, 0, 16], sizes = [2, 8, 8], strides = [1, 1, 1]} : vector<2x8x32xf32> to vector<2x8x8xf32>
    %75 = arith.truncf %74 : vector<2x8x8xf32> to vector<2x8x8xbf16>
    %76 = vector.extract_strided_slice %25 {offsets = [0, 0, 16], sizes = [2, 8, 8], strides = [1, 1, 1]} : vector<2x8x32xf32> to vector<2x8x8xf32>
    %77 = arith.truncf %76 : vector<2x8x8xf32> to vector<2x8x8xbf16>
    "tpu.trace_start"() <{level = 10 : i32, message = "bqd,bkd->bqk"}> : () -> ()
    %cst_24 = arith.constant dense<0.000000e+00> : vector<2x8x8xf32>
    %78 = tpu.matmul %73, %75, %cst_24 {dimension_numbers = #tpu.dot_dimension_numbers<[2], [2], [1], [1], [0, 0, 0, 1, 1, 1], [0], [0]>} : vector<2x8x8xbf16>, vector<2x8x8xbf16>, vector<2x8x8xf32> -> vector<2x8x8xf32>
    "tpu.trace_stop"() : () -> ()
    %cst_25 = arith.constant 0.353553385 : f32
    %79 = vector.broadcast %cst_25 : f32 to vector<2x8x8xf32>
    %80 = arith.mulf %78, %79 : vector<2x8x8xf32>
    %81 = vector.broadcast %11 : vector<2x1x8xf32> to vector<2x8x8xf32>
    %82 = arith.addf %80, %81 : vector<2x8x8xf32>
    %cst_26 = arith.constant dense<0xFF800000> : vector<2x8xf32>
    %83 = vector.multi_reduction <maximumf>, %82, %cst_26 [2] : vector<2x8x8xf32> to vector<2x8xf32>
    %84 = vector.shape_cast %83 : vector<2x8xf32> to vector<2x8x1xf32>
    %85 = vector.broadcast %84 : vector<2x8x1xf32> to vector<2x8x8xf32>
    %86 = arith.subf %82, %85 : vector<2x8x8xf32>
    %87 = math.exp %86 : vector<2x8x8xf32>
    %cst_27 = arith.constant dense<0.000000e+00> : vector<2x8xf32>
    %88 = vector.multi_reduction <add>, %87, %cst_27 [2] : vector<2x8x8xf32> to vector<2x8xf32>
    %89 = vector.shape_cast %88 : vector<2x8xf32> to vector<2x8x1xf32>
    %90 = arith.truncf %87 : vector<2x8x8xf32> to vector<2x8x8xbf16>
    "tpu.trace_start"() <{level = 10 : i32, message = "bqk,bkd->bqd"}> : () -> ()
    %cst_28 = arith.constant dense<0.000000e+00> : vector<2x8x8xf32>
    %91 = tpu.matmul %90, %77, %cst_28 {dimension_numbers = #tpu.dot_dimension_numbers<[2], [1], [1], [2], [0, 0, 0, 1, 1, 2], [0], [0]>} : vector<2x8x8xbf16>, vector<2x8x8xbf16>, vector<2x8x8xf32> -> vector<2x8x8xf32>
    "tpu.trace_stop"() : () -> ()
    %92 = tpu.reciprocal %89 : vector<2x8x1xf32> -> vector<2x8x1xf32>
    %93 = vector.broadcast %92 : vector<2x8x1xf32> to vector<2x8x8xf32>
    %94 = arith.mulf %91, %93 : vector<2x8x8xf32>
    %95 = vector.extract_strided_slice %21 {offsets = [0, 0, 24], sizes = [2, 8, 8], strides = [1, 1, 1]} : vector<2x8x32xf32> to vector<2x8x8xf32>
    %96 = arith.truncf %95 : vector<2x8x8xf32> to vector<2x8x8xbf16>
    %97 = vector.extract_strided_slice %23 {offsets = [0, 0, 24], sizes = [2, 8, 8], strides = [1, 1, 1]} : vector<2x8x32xf32> to vector<2x8x8xf32>
    %98 = arith.truncf %97 : vector<2x8x8xf32> to vector<2x8x8xbf16>
    %99 = vector.extract_strided_slice %25 {offsets = [0, 0, 24], sizes = [2, 8, 8], strides = [1, 1, 1]} : vector<2x8x32xf32> to vector<2x8x8xf32>
    %100 = arith.truncf %99 : vector<2x8x8xf32> to vector<2x8x8xbf16>
    "tpu.trace_start"() <{level = 10 : i32, message = "bqd,bkd->bqk"}> : () -> ()
    %cst_29 = arith.constant dense<0.000000e+00> : vector<2x8x8xf32>
    %101 = tpu.matmul %96, %98, %cst_29 {dimension_numbers = #tpu.dot_dimension_numbers<[2], [2], [1], [1], [0, 0, 0, 1, 1, 1], [0], [0]>} : vector<2x8x8xbf16>, vector<2x8x8xbf16>, vector<2x8x8xf32> -> vector<2x8x8xf32>
    "tpu.trace_stop"() : () -> ()
    %cst_30 = arith.constant 0.353553385 : f32
    %102 = vector.broadcast %cst_30 : f32 to vector<2x8x8xf32>
    %103 = arith.mulf %101, %102 : vector<2x8x8xf32>
    %104 = vector.broadcast %11 : vector<2x1x8xf32> to vector<2x8x8xf32>
    %105 = arith.addf %103, %104 : vector<2x8x8xf32>
    %cst_31 = arith.constant dense<0xFF800000> : vector<2x8xf32>
    %106 = vector.multi_reduction <maximumf>, %105, %cst_31 [2] : vector<2x8x8xf32> to vector<2x8xf32>
    %107 = vector.shape_cast %106 : vector<2x8xf32> to vector<2x8x1xf32>
    %108 = vector.broadcast %107 : vector<2x8x1xf32> to vector<2x8x8xf32>
    %109 = arith.subf %105, %108 : vector<2x8x8xf32>
    %110 = math.exp %109 : vector<2x8x8xf32>
    %cst_32 = arith.constant dense<0.000000e+00> : vector<2x8xf32>
    %111 = vector.multi_reduction <add>, %110, %cst_32 [2] : vector<2x8x8xf32> to vector<2x8xf32>
    %112 = vector.shape_cast %111 : vector<2x8xf32> to vector<2x8x1xf32>
    %113 = arith.truncf %110 : vector<2x8x8xf32> to vector<2x8x8xbf16>
    "tpu.trace_start"() <{level = 10 : i32, message = "bqk,bkd->bqd"}> : () -> ()
    %cst_33 = arith.constant dense<0.000000e+00> : vector<2x8x8xf32>
    %114 = tpu.matmul %113, %100, %cst_33 {dimension_numbers = #tpu.dot_dimension_numbers<[2], [1], [1], [2], [0, 0, 0, 1, 1, 2], [0], [0]>} : vector<2x8x8xbf16>, vector<2x8x8xbf16>, vector<2x8x8xf32> -> vector<2x8x8xf32>
    "tpu.trace_stop"() : () -> ()
    %115 = tpu.reciprocal %112 : vector<2x8x1xf32> -> vector<2x8x1xf32>
    %116 = vector.broadcast %115 : vector<2x8x1xf32> to vector<2x8x8xf32>
    %117 = arith.mulf %114, %116 : vector<2x8x8xf32>
    %118 = tpu.concatenate %48, %71, %94, %117 in 2 : vector<2x8x8xf32>, vector<2x8x8xf32>, vector<2x8x8xf32>, vector<2x8x8xf32> -> vector<2x8x32xf32>
    %119 = vector.shape_cast %118 : vector<2x8x32xf32> to vector<16x32xf32>
    %120 = arith.truncf %119 : vector<16x32xf32> to vector<16x32xbf16>
    %c0_34 = arith.constant 0 : index
    %c0_35 = arith.constant 0 : index
    %c0_36 = arith.constant 0 : index
    %121 = vector.load %arg9[%c0_34, %c0_35, %c0_36] : memref<1x32x32xbf16, #tpu.memory_space<vmem>>, vector<1x32x32xbf16>
    %122 = vector.shape_cast %121 : vector<1x32x32xbf16> to vector<32x32xbf16>
    %cst_37 = arith.constant dense<0.000000e+00> : vector<16x32xf32>
    %123 = tpu.matmul %120, %122, %cst_37 {dimension_numbers = #tpu.dot_dimension_numbers<[1], [0], [0], [1], [0, 0, 1, 1], [], []>} : vector<16x32xbf16>, vector<32x32xbf16>, vector<16x32xf32> -> vector<16x32xf32>
    %c0_38 = arith.constant 0 : index
    %c0_39 = arith.constant 0 : index
    %c0_40 = arith.constant 0 : index
    %124 = vector.load %arg10[%c0_38, %c0_39, %c0_40] : memref<1x1x32xf32, #tpu.memory_space<vmem>>, vector<1x1x32xf32>
    %125 = vector.shape_cast %124 : vector<1x1x32xf32> to vector<1x32xf32>
    %126 = vector.broadcast %125 : vector<1x32xf32> to vector<16x32xf32>
    %127 = arith.addf %123, %126 : vector<16x32xf32>
    %128 = arith.addf %5, %127 : vector<16x32xf32>
    %c0_41 = arith.constant 0 : index
    %c0_42 = arith.constant 0 : index
    %c0_43 = arith.constant 0 : index
    %129 = vector.load %arg11[%c0_41, %c0_42, %c0_43] : memref<1x1x32xf32, #tpu.memory_space<vmem>>, vector<1x1x32xf32>
    %130 = vector.shape_cast %129 : vector<1x1x32xf32> to vector<1x32xf32>
    %c0_44 = arith.constant 0 : index
    %c0_45 = arith.constant 0 : index
    %c0_46 = arith.constant 0 : index
    %131 = vector.load %arg12[%c0_44, %c0_45, %c0_46] : memref<1x1x32xf32, #tpu.memory_space<vmem>>, vector<1x1x32xf32>
    %132 = vector.shape_cast %131 : vector<1x1x32xf32> to vector<1x32xf32>
    %cst_47 = arith.constant dense<0.000000e+00> : vector<16xf32>
    %133 = vector.multi_reduction <add>, %128, %cst_47 [1] : vector<16x32xf32> to vector<16xf32>
    %134 = vector.shape_cast %133 : vector<16xf32> to vector<16x1xf32>
    %cst_48 = arith.constant 3.200000e+01 : f32
    %135 = vector.broadcast %cst_48 : f32 to vector<16x1xf32>
    %136 = arith.divf %134, %135 : vector<16x1xf32>
    %137 = vector.broadcast %136 : vector<16x1xf32> to vector<16x32xf32>
    %138 = arith.subf %128, %137 : vector<16x32xf32>
    %139 = arith.mulf %138, %138 : vector<16x32xf32>
    %cst_49 = arith.constant dense<0.000000e+00> : vector<16xf32>
    %140 = vector.multi_reduction <add>, %139, %cst_49 [1] : vector<16x32xf32> to vector<16xf32>
    %141 = vector.shape_cast %140 : vector<16xf32> to vector<16x1xf32>
    %cst_50 = arith.constant 3.200000e+01 : f32
    %142 = vector.broadcast %cst_50 : f32 to vector<16x1xf32>
    %143 = arith.divf %141, %142 : vector<16x1xf32>
    %144 = vector.broadcast %136 : vector<16x1xf32> to vector<16x32xf32>
    %145 = arith.subf %128, %144 : vector<16x32xf32>
    %cst_51 = arith.constant 9.99999974E-6 : f32
    %146 = vector.broadcast %cst_51 : f32 to vector<16x1xf32>
    %147 = arith.addf %143, %146 : vector<16x1xf32>
    %148 = math.rsqrt %147 : vector<16x1xf32>
    %149 = vector.broadcast %148 : vector<16x1xf32> to vector<16x32xf32>
    %150 = arith.mulf %145, %149 : vector<16x32xf32>
    %151 = vector.broadcast %130 : vector<1x32xf32> to vector<16x32xf32>
    %152 = arith.mulf %150, %151 : vector<16x32xf32>
    %153 = vector.broadcast %132 : vector<1x32xf32> to vector<16x32xf32>
    %154 = arith.addf %152, %153 : vector<16x32xf32>
    %155 = arith.truncf %154 : vector<16x32xf32> to vector<16x32xbf16>
    %c0_52 = arith.constant 0 : index
    %c0_53 = arith.constant 0 : index
    %c0_54 = arith.constant 0 : index
    %156 = vector.load %arg15[%c0_52, %c0_53, %c0_54] : memref<1x32x64xbf16, #tpu.memory_space<vmem>>, vector<1x32x64xbf16>
    %157 = vector.shape_cast %156 : vector<1x32x64xbf16> to vector<32x64xbf16>
    %cst_55 = arith.constant dense<0.000000e+00> : vector<16x64xf32>
    %158 = tpu.matmul %155, %157, %cst_55 {dimension_numbers = #tpu.dot_dimension_numbers<[1], [0], [0], [1], [0, 0, 1, 1], [], []>} : vector<16x32xbf16>, vector<32x64xbf16>, vector<16x64xf32> -> vector<16x64xf32>
    %c0_56 = arith.constant 0 : index
    %c0_57 = arith.constant 0 : index
    %c0_58 = arith.constant 0 : index
    %159 = vector.load %arg16[%c0_56, %c0_57, %c0_58] : memref<1x1x64xf32, #tpu.memory_space<vmem>>, vector<1x1x64xf32>
    %160 = vector.shape_cast %159 : vector<1x1x64xf32> to vector<1x64xf32>
    %161 = vector.broadcast %160 : vector<1x64xf32> to vector<16x64xf32>
    %162 = arith.addf %158, %161 : vector<16x64xf32>
    %cst_59 = arith.constant 0.000000e+00 : f32
    %163 = vector.broadcast %cst_59 : f32 to vector<16x64xf32>
    %164 = arith.maximumf %162, %163 : vector<16x64xf32>
    %165 = arith.truncf %164 : vector<16x64xf32> to vector<16x64xbf16>
    %c0_60 = arith.constant 0 : index
    %c0_61 = arith.constant 0 : index
    %c0_62 = arith.constant 0 : index
    %166 = vector.load %arg17[%c0_60, %c0_61, %c0_62] : memref<1x64x32xbf16, #tpu.memory_space<vmem>>, vector<1x64x32xbf16>
    %167 = vector.shape_cast %166 : vector<1x64x32xbf16> to vector<64x32xbf16>
    %cst_63 = arith.constant dense<0.000000e+00> : vector<16x32xf32>
    %168 = tpu.matmul %165, %167, %cst_63 {dimension_numbers = #tpu.dot_dimension_numbers<[1], [0], [0], [1], [0, 0, 1, 1], [], []>} : vector<16x64xbf16>, vector<64x32xbf16>, vector<16x32xf32> -> vector<16x32xf32>
    %c0_64 = arith.constant 0 : index
    %c0_65 = arith.constant 0 : index
    %c0_66 = arith.constant 0 : index
    %169 = vector.load %arg18[%c0_64, %c0_65, %c0_66] : memref<1x1x32xf32, #tpu.memory_space<vmem>>, vector<1x1x32xf32>
    %170 = vector.shape_cast %169 : vector<1x1x32xf32> to vector<1x32xf32>
    %171 = vector.broadcast %170 : vector<1x32xf32> to vector<16x32xf32>
    %172 = arith.addf %168, %171 : vector<16x32xf32>
    %173 = arith.addf %154, %172 : vector<16x32xf32>
    %c0_67 = arith.constant 0 : index
    %c0_68 = arith.constant 0 : index
    %c0_69 = arith.constant 0 : index
    %174 = vector.load %arg13[%c0_67, %c0_68, %c0_69] : memref<1x1x32xf32, #tpu.memory_space<vmem>>, vector<1x1x32xf32>
    %175 = vector.shape_cast %174 : vector<1x1x32xf32> to vector<1x32xf32>
    %c0_70 = arith.constant 0 : index
    %c0_71 = arith.constant 0 : index
    %c0_72 = arith.constant 0 : index
    %176 = vector.load %arg14[%c0_70, %c0_71, %c0_72] : memref<1x1x32xf32, #tpu.memory_space<vmem>>, vector<1x1x32xf32>
    %177 = vector.shape_cast %176 : vector<1x1x32xf32> to vector<1x32xf32>
    %cst_73 = arith.constant dense<0.000000e+00> : vector<16xf32>
    %178 = vector.multi_reduction <add>, %173, %cst_73 [1] : vector<16x32xf32> to vector<16xf32>
    %179 = vector.shape_cast %178 : vector<16xf32> to vector<16x1xf32>
    %cst_74 = arith.constant 3.200000e+01 : f32
    %180 = vector.broadcast %cst_74 : f32 to vector<16x1xf32>
    %181 = arith.divf %179, %180 : vector<16x1xf32>
    %182 = vector.broadcast %181 : vector<16x1xf32> to vector<16x32xf32>
    %183 = arith.subf %173, %182 : vector<16x32xf32>
    %184 = arith.mulf %183, %183 : vector<16x32xf32>
    %cst_75 = arith.constant dense<0.000000e+00> : vector<16xf32>
    %185 = vector.multi_reduction <add>, %184, %cst_75 [1] : vector<16x32xf32> to vector<16xf32>
    %186 = vector.shape_cast %185 : vector<16xf32> to vector<16x1xf32>
    %cst_76 = arith.constant 3.200000e+01 : f32
    %187 = vector.broadcast %cst_76 : f32 to vector<16x1xf32>
    %188 = arith.divf %186, %187 : vector<16x1xf32>
    %189 = vector.broadcast %181 : vector<16x1xf32> to vector<16x32xf32>
    %190 = arith.subf %173, %189 : vector<16x32xf32>
    %cst_77 = arith.constant 9.99999974E-6 : f32
    %191 = vector.broadcast %cst_77 : f32 to vector<16x1xf32>
    %192 = arith.addf %188, %191 : vector<16x1xf32>
    %193 = math.rsqrt %192 : vector<16x1xf32>
    %194 = vector.broadcast %193 : vector<16x1xf32> to vector<16x32xf32>
    %195 = arith.mulf %190, %194 : vector<16x32xf32>
    %196 = vector.broadcast %175 : vector<1x32xf32> to vector<16x32xf32>
    %197 = arith.mulf %195, %196 : vector<16x32xf32>
    %198 = vector.broadcast %177 : vector<1x32xf32> to vector<16x32xf32>
    %199 = arith.addf %197, %198 : vector<16x32xf32>
    %c0_78 = arith.constant 0 : index
    %c0_79 = arith.constant 0 : index
    %200 = vector.load %arg24[%c0_78, %c0_79] : memref<16x32xf32, #tpu.memory_space<vmem>>, vector<16x32xf32>
    tpu.vector_store %arg24[%c0_78, %c0_79], %199 {strides = array<i32>} : memref<16x32xf32, #tpu.memory_space<vmem>>, vector<16x32xf32>,
    %c1_i32 = arith.constant 1 : i32
    %201 = arith.cmpi eq, %arg1, %c1_i32 : i32
    %202 = arith.extui %201 : i1 to i32
    %c0_i32_80 = arith.constant 0 : i32
    %203 = arith.cmpi ne, %202, %c0_i32_80 : i32
    scf.if %203 {
      %c0_i32_81 = arith.constant 0 : i32
      %204 = vector.broadcast %c0_i32_81 : i32 to vector<2x8xi32>
      %205 = arith.cmpi ne, %1, %204 : vector<2x8xi32>
      %206 = arith.extui %205 : vector<2x8xi1> to vector<2x8xi32>
      %207 = arith.sitofp %206 : vector<2x8xi32> to vector<2x8xf32>
      %cst_82 = arith.constant dense<0.000000e+00> : vector<2xf32>
      %208 = vector.multi_reduction <add>, %207, %cst_82 [1] : vector<2x8xf32> to vector<2xf32>
      %209 = vector.shape_cast %208 : vector<2xf32> to vector<2x1xf32>
      %210 = vector.shape_cast %199 : vector<16x32xf32> to vector<2x8x32xf32>
      %cst_83 = arith.constant dense<0.000000e+00> : vector<2x32xf32>
      %211 = vector.multi_reduction <add>, %210, %cst_83 [1] : vector<2x8x32xf32> to vector<2x32xf32>
      %212 = vector.broadcast %209 : vector<2x1xf32> to vector<2x32xf32>
      %213 = arith.divf %211, %212 : vector<2x32xf32>
      %214 = arith.truncf %213 : vector<2x32xf32> to vector<2x32xbf16>
      %c0_84 = arith.constant 0 : index
      %c0_85 = arith.constant 0 : index
      %215 = vector.load %arg19[%c0_84, %c0_85] : memref<32x64xbf16, #tpu.memory_space<vmem>>, vector<32x64xbf16>
      %cst_86 = arith.constant dense<0.000000e+00> : vector<2x64xf32>
      %216 = tpu.matmul %214, %215, %cst_86 {dimension_numbers = #tpu.dot_dimension_numbers<[1], [0], [0], [1], [0, 0, 1, 1], [], []>} : vector<2x32xbf16>, vector<32x64xbf16>, vector<2x64xf32> -> vector<2x64xf32>
      %c0_87 = arith.constant 0 : index
      %c0_88 = arith.constant 0 : index
      %217 = vector.load %arg20[%c0_87, %c0_88] : memref<1x64xf32, #tpu.memory_space<vmem>>, vector<1x64xf32>
      %218 = vector.broadcast %217 : vector<1x64xf32> to vector<2x64xf32>
      %219 = arith.addf %216, %218 : vector<2x64xf32>
      %cst_89 = arith.constant 0.000000e+00 : f32
      %220 = vector.broadcast %cst_89 : f32 to vector<2x64xf32>
      %221 = arith.maximumf %219, %220 : vector<2x64xf32>
      %222 = arith.truncf %221 : vector<2x64xf32> to vector<2x64xbf16>
      %c0_90 = arith.constant 0 : index
      %c0_91 = arith.constant 0 : index
      %223 = vector.load %arg21[%c0_90, %c0_91] : memref<64x24xbf16, #tpu.memory_space<vmem>>, vector<64x24xbf16>
      %cst_92 = arith.constant dense<0.000000e+00> : vector<2x24xf32>
      %224 = tpu.matmul %222, %223, %cst_92 {dimension_numbers = #tpu.dot_dimension_numbers<[1], [0], [0], [1], [0, 0, 1, 1], [], []>} : vector<2x64xbf16>, vector<64x24xbf16>, vector<2x24xf32> -> vector<2x24xf32>
      %c0_93 = arith.constant 0 : index
      %c0_94 = arith.constant 0 : index
      %225 = vector.load %arg22[%c0_93, %c0_94] : memref<1x24xf32, #tpu.memory_space<vmem>>, vector<1x24xf32>
      %226 = vector.broadcast %225 : vector<1x24xf32> to vector<2x24xf32>
      %227 = arith.addf %224, %226 : vector<2x24xf32>
      %228 = vector.extract_strided_slice %227 {offsets = [0, 0], sizes = [2, 8], strides = [1, 1]} : vector<2x24xf32> to vector<2x8xf32>
      %229 = vector.extract_strided_slice %227 {offsets = [0, 8], sizes = [2, 8], strides = [1, 1]} : vector<2x24xf32> to vector<2x8xf32>
      %230 = vector.extract_strided_slice %227 {offsets = [0, 16], sizes = [2, 8], strides = [1, 1]} : vector<2x24xf32> to vector<2x8xf32>
      %231 = arith.maximumf %228, %229 : vector<2x8xf32>
      %232 = arith.maximumf %231, %230 : vector<2x8xf32>
      %233 = arith.subf %228, %232 : vector<2x8xf32>
      %234 = math.exp %233 : vector<2x8xf32>
      %235 = arith.subf %229, %232 : vector<2x8xf32>
      %236 = math.exp %235 : vector<2x8xf32>
      %237 = arith.subf %230, %232 : vector<2x8xf32>
      %238 = math.exp %237 : vector<2x8xf32>
      %239 = arith.addf %234, %236 : vector<2x8xf32>
      %240 = arith.addf %239, %238 : vector<2x8xf32>
      %241 = tpu.reciprocal %240 : vector<2x8xf32> -> vector<2x8xf32>
      %242 = arith.mulf %234, %241 : vector<2x8xf32>
      %c0_95 = arith.constant 0 : index
      %c0_96 = arith.constant 0 : index
      %c0_97 = arith.constant 0 : index
      %243 = vector.load %arg23[%c0_95, %c0_96, %c0_97] : memref<1x2x24xf32, #tpu.memory_space<vmem>>, vector<1x2x8xf32>
      %244 = vector.shape_cast %243 : vector<1x2x8xf32> to vector<2x8xf32>
      %245 = vector.shape_cast %242 : vector<2x8xf32> to vector<1x2x8xf32>
      tpu.vector_store %arg23[%c0_95, %c0_96, %c0_97], %245 {strides = array<i32>} : memref<1x2x24xf32, #tpu.memory_space<vmem>>, vector<1x2x8xf32>,
      %246 = arith.mulf %236, %241 : vector<2x8xf32>
      %c0_98 = arith.constant 0 : index
      %c0_99 = arith.constant 0 : index
      %c8 = arith.constant 8 : index
      %247 = vector.load %arg23[%c0_98, %c0_99, %c8] : memref<1x2x24xf32, #tpu.memory_space<vmem>>, vector<1x2x8xf32>
      %248 = vector.shape_cast %247 : vector<1x2x8xf32> to vector<2x8xf32>
      %249 = vector.shape_cast %246 : vector<2x8xf32> to vector<1x2x8xf32>
      tpu.vector_store %arg23[%c0_98, %c0_99, %c8], %249 {strides = array<i32>} : memref<1x2x24xf32, #tpu.memory_space<vmem>>, vector<1x2x8xf32>,
      %250 = arith.mulf %238, %241 : vector<2x8xf32>
      %c0_100 = arith.constant 0 : index
      %c0_101 = arith.constant 0 : index
      %c16 = arith.constant 16 : index
      %251 = vector.load %arg23[%c0_100, %c0_101, %c16] : memref<1x2x24xf32, #tpu.memory_space<vmem>>, vector<1x2x8xf32>
      %252 = vector.shape_cast %251 : vector<1x2x8xf32> to vector<2x8xf32>
      %253 = vector.shape_cast %250 : vector<2x8xf32> to vector<1x2x8xf32>
      tpu.vector_store %arg23[%c0_100, %c0_101, %c16], %253 {strides = array<i32>} : memref<1x2x24xf32, #tpu.memory_space<vmem>>, vector<1x2x8xf32>,
    } else {
    }
    return
  }
  func.func @transform_0(%arg0: i32, %arg1: i32) -> (i32, i32, i32) {
    %c0_i32 = arith.constant 0 : i32
    %c0_i32_0 = arith.constant 0 : i32
    %c0_i32_1 = arith.constant 0 : i32
    return %arg0, %c0_i32, %c0_i32_0 : i32, i32, i32
  }
  func.func @transform_1(%arg0: i32, %arg1: i32) -> (i32, i32, i32) {
    %c0_i32 = arith.constant 0 : i32
    %c0_i32_0 = arith.constant 0 : i32
    %c0_i32_1 = arith.constant 0 : i32
    return %arg0, %c0_i32, %c0_i32_0 : i32, i32, i32
  }
  func.func @transform_2(%arg0: i32, %arg1: i32) -> (i32, i32, i32) {
    %c0_i32 = arith.constant 0 : i32
    %c0_i32_0 = arith.constant 0 : i32
    %c0_i32_1 = arith.constant 0 : i32
    return %arg0, %c0_i32, %c0_i32_0 : i32, i32, i32
  }
  func.func @transform_3(%arg0: i32, %arg1: i32) -> (i32, i32) {
    %c0_i32 = arith.constant 0 : i32
    %c0_i32_0 = arith.constant 0 : i32
    %c0_i32_1 = arith.constant 0 : i32
    return %c0_i32, %c0_i32_0 : i32, i32
  }
  func.func @transform_4(%arg0: i32, %arg1: i32) -> (i32, i32) {
    %c0_i32 = arith.constant 0 : i32
    %c0_i32_0 = arith.constant 0 : i32
    %c0_i32_1 = arith.constant 0 : i32
    return %c0_i32, %c0_i32_0 : i32, i32
  }
  func.func @transform_5(%arg0: i32, %arg1: i32) -> (i32, i32, i32) {
    %c0_i32 = arith.constant 0 : i32
    %c0_i32_0 = arith.constant 0 : i32
    %c0_i32_1 = arith.constant 0 : i32
    return %arg1, %c0_i32, %c0_i32_0 : i32, i32, i32
  }
  func.func @transform_6(%arg0: i32, %arg1: i32) -> (i32, i32, i32) {
    %c0_i32 = arith.constant 0 : i32
    %c0_i32_0 = arith.constant 0 : i32
    %c0_i32_1 = arith.constant 0 : i32
    return %arg1, %c0_i32, %c0_i32_0 : i32, i32, i32
  }
  func.func @transform_7(%arg0: i32, %arg1: i32) -> (i32, i32, i32) {
    %c0_i32 = arith.constant 0 : i32
    %c0_i32_0 = arith.constant 0 : i32
    %c0_i32_1 = arith.constant 0 : i32
    return %arg1, %c0_i32, %c0_i32_0 : i32, i32, i32
  }
  func.func @transform_8(%arg0: i32, %arg1: i32) -> (i32, i32, i32) {
    %c0_i32 = arith.constant 0 : i32
    %c0_i32_0 = arith.constant 0 : i32
    %c0_i32_1 = arith.constant 0 : i32
    return %arg1, %c0_i32, %c0_i32_0 : i32, i32, i32
  }
  func.func @transform_9(%arg0: i32, %arg1: i32) -> (i32, i32, i32) {
    %c0_i32 = arith.constant 0 : i32
    %c0_i32_0 = arith.constant 0 : i32
    %c0_i32_1 = arith.constant 0 : i32
    return %arg1, %c0_i32, %c0_i32_0 : i32, i32, i32
  }
  func.func @transform_10(%arg0: i32, %arg1: i32) -> (i32, i32, i32) {
    %c0_i32 = arith.constant 0 : i32
    %c0_i32_0 = arith.constant 0 : i32
    %c0_i32_1 = arith.constant 0 : i32
    return %arg1, %c0_i32, %c0_i32_0 : i32, i32, i32
  }
  func.func @transform_11(%arg0: i32, %arg1: i32) -> (i32, i32, i32) {
    %c0_i32 = arith.constant 0 : i32
    %c0_i32_0 = arith.constant 0 : i32
    %c0_i32_1 = arith.constant 0 : i32
    return %arg1, %c0_i32, %c0_i32_0 : i32, i32, i32
  }
  func.func @transform_12(%arg0: i32, %arg1: i32) -> (i32, i32, i32) {
    %c0_i32 = arith.constant 0 : i32
    %c0_i32_0 = arith.constant 0 : i32
    %c0_i32_1 = arith.constant 0 : i32
    return %arg1, %c0_i32, %c0_i32_0 : i32, i32, i32
  }
  func.func @transform_13(%arg0: i32, %arg1: i32) -> (i32, i32, i32) {
    %c0_i32 = arith.constant 0 : i32
    %c0_i32_0 = arith.constant 0 : i32
    %c0_i32_1 = arith.constant 0 : i32
    return %arg1, %c0_i32, %c0_i32_0 : i32, i32, i32
  }
  func.func @transform_14(%arg0: i32, %arg1: i32) -> (i32, i32, i32) {
    %c0_i32 = arith.constant 0 : i32
    %c0_i32_0 = arith.constant 0 : i32
    %c0_i32_1 = arith.constant 0 : i32
    return %arg1, %c0_i32, %c0_i32_0 : i32, i32, i32
  }
  func.func @transform_15(%arg0: i32, %arg1: i32) -> (i32, i32, i32) {
    %c0_i32 = arith.constant 0 : i32
    %c0_i32_0 = arith.constant 0 : i32
    %c0_i32_1 = arith.constant 0 : i32
    return %arg1, %c0_i32, %c0_i32_0 : i32, i32, i32
  }
  func.func @transform_16(%arg0: i32, %arg1: i32) -> (i32, i32, i32) {
    %c0_i32 = arith.constant 0 : i32
    %c0_i32_0 = arith.constant 0 : i32
    %c0_i32_1 = arith.constant 0 : i32
    return %arg1, %c0_i32, %c0_i32_0 : i32, i32, i32
  }
  func.func @transform_17(%arg0: i32, %arg1: i32) -> (i32, i32) {
    %c0_i32 = arith.constant 0 : i32
    %c0_i32_0 = arith.constant 0 : i32
    %c0_i32_1 = arith.constant 0 : i32
    return %c0_i32, %c0_i32_0 : i32, i32
  }
  func.func @transform_18(%arg0: i32, %arg1: i32) -> (i32, i32) {
    %c0_i32 = arith.constant 0 : i32
    %c0_i32_0 = arith.constant 0 : i32
    %c0_i32_1 = arith.constant 0 : i32
    return %c0_i32, %c0_i32_0 : i32, i32
  }
  func.func @transform_19(%arg0: i32, %arg1: i32) -> (i32, i32) {
    %c0_i32 = arith.constant 0 : i32
    %c0_i32_0 = arith.constant 0 : i32
    %c0_i32_1 = arith.constant 0 : i32
    return %c0_i32, %c0_i32_0 : i32, i32
  }
  func.func @transform_20(%arg0: i32, %arg1: i32) -> (i32, i32) {
    %c0_i32 = arith.constant 0 : i32
    %c0_i32_0 = arith.constant 0 : i32
    %c0_i32_1 = arith.constant 0 : i32
    return %c0_i32, %c0_i32_0 : i32, i32
  }
  func.func @transform_21(%arg0: i32, %arg1: i32) -> (i32, i32, i32) {
    %c0_i32 = arith.constant 0 : i32
    %c0_i32_0 = arith.constant 0 : i32
    %c0_i32_1 = arith.constant 0 : i32
    return %arg0, %c0_i32, %c0_i32_0 : i32, i32, i32
  }
}

</mosaic_0001>

<bundles_post_ra>
// kernel: tpu_custom_call.1
= control target key start
LH: loop header
LB: loop body
LE: loop exit
PB: predicated region body
PF: predicated region fallthrough
CT: control target
= control target key end

     0   :  { %s4100_s0 = inlined_call_operand.vmem [shape: s32[2,2,8], index: 0, kind: input, shape index: {}]   ;;  %s4101_s1 = inlined_call_operand.vmem [shape: s32[2,16,1], index: 1, kind: input, shape index: {}]   ;;  %s4102_s2 = inlined_call_operand.vmem [shape: f32[2,16,1], index: 2, kind: input, shape index: {}]   ;;  %s4103_s3 = inlined_call_operand.vmem [shape: f32[8,32], index: 3, kind: input, shape index: {}]   ;;  %s4104_s4 = inlined_call_operand.vmem [shape: f32[9,32], index: 4, kind: input, shape index: {}]   ;;  %s4105_s5 = inlined_call_operand.vmem [shape: bf16[2,32,96], index: 5, kind: input, shape index: {}]   ;;  %s4106_s6 = inlined_call_operand.vmem [shape: f32[2,1,96], index: 6, kind: input, shape index: {}]   ;;  %s4107_s7 = inlined_call_operand.vmem [shape: bf16[2,32,32], index: 7, kind: input, shape index: {}]   ;;  %s4108_s8 = inlined_call_operand.vmem [shape: f32[2,1,32], index: 8, kind: input, shape index: {}]   ;;  %s4109_s9 = inlined_call_operand.vmem [shape: f32[2,1,32], index: 9, kind: input, shape index: {}]   ;;  %s4110_s10 = inlined_call_operand.vmem [shape: f32[2,1,32], index: 10, kind: input, shape index: {}]   ;;  %s4111_s11 = inlined_call_operand.vmem [shape: f32[2,1,32], index: 11, kind: input, shape index: {}]   ;;  %s4112_s12 = inlined_call_operand.vmem [shape: f32[2,1,32], index: 12, kind: input, shape index: {}]   ;;  %s4113_s13 = inlined_call_operand.vmem [shape: bf16[2,32,64], index: 13, kind: input, shape index: {}]   ;;  %s4114_s14 = inlined_call_operand.vmem [shape: f32[2,1,64], index: 14, kind: input, shape index: {}]   ;;  %s4115_s15 = inlined_call_operand.vmem [shape: bf16[2,64,32], index: 15, kind: input, shape index: {}]   ;;  %s4116_s16 = inlined_call_operand.vmem [shape: f32[2,1,32], index: 16, kind: input, shape index: {}]   ;;  %s4117_s17 = inlined_call_operand.vmem [shape: bf16[32,64], index: 17, kind: input, shape index: {}]   ;;  %s4118_s18 = inlined_call_operand.vmem [shape: f32[1,64], index: 18, kind: input, shape index: {}]   ;;  %s4119_s19 = inlined_call_operand.vmem [shape: bf16[64,24], index: 19, kind: input, shape index: {}]   ;;  %s4120_s20 = inlined_call_operand.vmem [shape: f32[1,24], index: 20, kind: input, shape index: {}]   ;;  %s4121_s21 = inlined_call_operand.hbm [shape: f32[2,2,24], index: 21, kind: output, shape index: {}]  }
   0x1   :  { %4142 = sst [smem:[#allocation21_spill]] %s4100_s0 }
   0x2   :  { %4143 = sst [smem:[#allocation22_spill]] %s4101_s1 }
   0x3   :  { %4144 = sst [smem:[#allocation23_spill]] %s4102_s2 }
   0x4   :  { %4145 = sst [smem:[#allocation24_spill]] %s4103_s3 }
   0x5   :  { %4146 = sst [smem:[#allocation25_spill]] %s4104_s4 }
   0x6   :  { %4147 = sst [smem:[#allocation26_spill]] %s4105_s5 }
   0x7   :  { %4148 = sst [smem:[#allocation27_spill]] %s4107_s7 }
   0x8   :  { %4149 = sst [smem:[#allocation28_spill]] %s4115_s15 }
   0x9   :  { %4150 = sst [smem:[#allocation29_spill]] %s4117_s17 }
   0xa   :  { %4151 = sst [smem:[#allocation30_spill]] %s4118_s18 }
   0xb   :  { %4152 = sst [smem:[#allocation31_spill]] %s4119_s19 }
   0xc   :  { %4153 = sst [smem:[#allocation32_spill]] %s4120_s20 }
   0xd   :  { %4154 = sst [smem:[#allocation33_spill]] %s4121_s21 }
   0xe   :  { %26 = vsyncpa [#allocation4], 0 }
   0xf   :  { %28 = vsyncpa [#allocation4 + $0x1], 0  ;;  %s3584_s2 = smov 0   ;;  %s3586_s25 = smov 0  }
  0x10   :  { %s3588_s26 = smov 0   ;;  %s3590_s27 = smov 0  }
  0x11   :  { %s3592_s3 = smov 0   ;;  %s3594_s28 = smov 0  }
  0x12   :  { %s3596_s29 = smov 0   ;;  %s3598_s0 = smov 0  }
  0x13 LB: > { %4155 = sst [smem:[#allocation6_spill]] %s3417_s2  ;;  %s2860_s4 = sadd.s32 4294967295, %s3445_s0   ;;  %s3445_s0 = sphi %s3598_s0, %s34_s0   ;;  %s3441_s29 = sphi %s3596_s29, %s4208_s29   ;;  %s3437_s28 = sphi %s3594_s28, %s4207_s28   ;;  %s3433_s3 = sphi %s3592_s3, %s4206_s3   ;;  %s3429_s27 = sphi %s3590_s27, %s4205_s27   ;;  %s3425_s26 = sphi %s3588_s26, %s4204_s26   ;;  %s3421_s25 = sphi %s3586_s25, %s4203_s25   ;;  %s3417_s2 = sphi %s3584_s2, %s4202_s2  }
  0x14   : > { %4156 = sst [smem:[#allocation7_spill]] %s3421_s25  ;;  %s2861_s30 = sadd.s32 4294967294, %s3445_s0  }
  0x15   : > { %4157 = sst [smem:[#allocation8_spill]] %s3425_s26  ;;  %s43_s5 = sadd.s32 1, %s3437_s28 }
  0x16   : > { %4158 = sst [smem:[#allocation9_spill]] %s3429_s27  ;;  %p44_p0 = scmp.ge.s32.totalorder %s43_s5, 2 }
  0x17   : > { %4159 = sst [smem:[#allocation10_spill]] %s3433_s3  ;;  %s46_s22 = sadd.s32 1, %s3441_s29 }
  0x18   : > { %4160 = sst [smem:[#allocation11_spill]] %s3437_s28  ;;  %p579_p1 = scmp.ne.s32.totalorder %s3425_s26, %s3421_s25 }
  0x19   : > { %4161 = sst [smem:[#allocation12_spill]] %s3441_s29  ;;  %p580_p2 = scmp.eq.s32.totalorder %s2860_s4, 3 }
  0x1a   : > { %4162 = sst [smem:[#allocation13_spill]] %s3445_s0  ;;  %s4210_s5 = smov (%p44_p0, %s43_s5), 0 }
  0x1b   : > { %4163 = sst [smem:[#allocation14_spill]] %s4210_s5  ;;  %s4212_s22 = smov (!%p44_p0, %s46_s22), %s3441_s29 }
  0x1c   : > { %p3633_p3 = por %p580_p2, %p579_p1  ;;  %p585_p4 = scmp.ne.s32.totalorder %s3421_s25, %s3417_s2 }
  0x1d   : > { %p48_p5 = scmp.ge.s32.totalorder %s4212_s22, 2  ;;  %p586_p6 = scmp.eq.s32.totalorder %s2861_s30, 3 }
  0x1e   : > { %s4164_s23 = scalar_select %p3633_p3, 1, 0 }
  0x1f   : > { %p2864_p7 = scmp.ge.s32.totalorder %s3445_s0, 1  ;;  %p725_p8 = scmp.lt.s32.totalorder %s3445_s0, 5 }
  0x20   : > { %4165 = sst [smem:[#allocation15_spill]] %s4164_s23  ;;  %s4214_s22 = smov (%p48_p5, %s4212_s22), 0 }
  0x21   : > { %4166 = sst [smem:[#allocation16_spill]] %s4214_s22  ;;  %p3643_p9 = por %p586_p6, %p585_p4 }
  0x22   : > { %p726_p10 = pnand %p2864_p7, %p725_p8  ;;  %s566_s24 = ssub.s32 %s3441_s29, %s4214_s22 }
  0x23   : > { %s4167_s1 = scalar_select %p3643_p9, 1, 0 }
  0x24   : > { %s569_s4 = sadd.s32 1, %s3425_s26  ;;  %p567_p11 = scmp.eq.s32.totalorder %s566_s24, 0 }
  0x25   : > { %4168 = sst [smem:[#allocation17_spill]] %s4167_s1  ;;  %729 = sbr.rel (%p726_p10) target bundleno = 4915 (0x1333), region = 104 }
  0x26   : > { %s3651_s5 = scalar_select %p567_p11, %s3425_s26, %s569_s4  }
  0x28   : > { %4169 = sst [smem:[#allocation18_spill]] %s3651_s5 }
  0x2c   : > { %s4129_s30 = sand.u32 1, %s3421_s25   ;;  %p838_p12 = scmp.lt.s32.totalorder %s3433_s3, 1 }
  0x2d   : > { %s2865_s28 = sshll.u32 %s4129_s30, 1  ;;  %p852_p13 = scmp.lt.s32.totalorder %s3429_s27, 1 }
  0x2e   : > { %s839_s2 = scalar_select %p838_p12, %s3433_s3, 1 }
  0x2f   : > { %s3660_s1 = scalar_select %p852_p13, %s3429_s27, 1 }
  0x30   : > { %s2866_s24 = sshll.u32 %s839_s2, 1  ;;  %s2940_s4 = sshll.u32 %s839_s2, 4 }
  0x31   : > { %s4170_s5 = sld [smem:[#allocation21_spill]]  ;;  %s4171_s21 = sld [smem:[#allocation22_spill]] }
  0x32   : > { %s4172_s20 = sld [smem:[#allocation23_spill]]  ;;  %s2942_s19 = sshll.u32 %s3660_s1, 4 }
  0x33   : > { %s4173_s2 = sld [smem:[#allocation26_spill]]  ;;  %s4175_s7 = sld [smem:[#allocation27_spill]] }
  0x34   : > { %s879_s0 = scalar_lea.vmem %s4112_s12, %s3660_s1  ;;  %s3711_s30 = scalar_lea.vmem %s4113_s13, %s2942_s19 }
  0x35   : > { %s887_s3 = scalar_lea.vmem %s4114_s14, %s3660_s1  ;;  %s4177_s22 = sld [smem:[#allocation28_spill]] }
  0x37   : > { %s841_s26 = scalar_lea.vmem %s4170_s5, %s2866_s24  ;;  %s846_s23 = scalar_lea.vmem %s4171_s21, %s2940_s4 }
  0x38   : > { %s851_s18 = scalar_lea.vmem %s4172_s20, %s2940_s4  ;;  %v3672_v0 = vld [vmem:[%s841_s26] sm:$0x3]  ;;  %s2945_s4 = sshll.u32 %s3660_s1, 5 }
  0x39   : > { %s3677_s15 = scalar_lea.vmem %s4173_s2, %s2942_s19  ;;  %s3686_s21 = scalar_lea.vmem %s4175_s7, %s2942_s19 }
  0x3a   : > { %4174 = sst [smem:[#allocation19_spill]] %s3677_s15  ;;  %s895_s2 = scalar_lea.vmem %s4116_s16, %s3660_s1 }
  0x3b   : > { %4176 = sst [smem:[#allocation20_spill]] %s3686_s21  ;;  %s3725_s20 = scalar_lea.vmem %s4177_s22, %s2945_s4 }
  0x3c   : > { %s3727_s5 = scalar_lea.vmem [#allocation3], %s2865_s28  ;;  %s4178_s24 = sld [smem:[#allocation9_spill]] }
  0x42   : > { %p2879_p0 = scmp.ne.s32.totalorder %s4178_s24, 0 }
  0x43   : > { %v904_v1 = vld [vmem:[%s851_s18] sm:$0xff] (!%p2879_p0)  ;;  %v3447_v3 = vmov (!%p2879_p0), 0   ;;  %v905_v4 = vld [vmem:[%s851_s18 + $0x8] sm:$0xff] (!%p2879_p0)  ;;  %s4179_s21 = sld [smem:[#allocation25_spill]] (!%p2879_p0)  ;;  %vm949_vm0 = vcmask (!%p2879_p0), 1040384   ;;  %vm3448_vm1 = vmmov (!%p2879_p0), 1   ;;  %v906_v9 = vlaneseq (!%p2879_p0) }
  0x44   : > { %901 = sbr.rel (%p2879_p0) target bundleno = 423 (0x1a7), region = 108  ;;  %v902_v2 = vld [vmem:[%s846_s23] sm:$0xff] (!%p2879_p0)  ;;  %3267 = vset.pattern.permute.xlu1 (!%p2879_p0), %v3447_v3  ;;  %3266 = vset.pattern.permute.xlu0 (!%p2879_p0), %v3447_v3  ;;  %v903_v5 = vld [vmem:[%s846_s23 + $0x8] sm:$0xff] (!%p2879_p0)  ;;  %vm3164_vm2 = vmpackc.low (!%p2879_p0), %vm949_vm0, %vm3448_vm1  ;;  %v3449_v14 = vmov (!%p2879_p0), 0.0   ;;  %vm942_vm6 = vcmask (!%p2879_p0), 72704   ;;  %s4180_s23 = sld [smem:[#allocation24_spill]] (!%p2879_p0) }
  0x45   : > { %923 = vperm.xlu1 (!%p2879_p0), %3267, %v904_v1   ;;  %909 = vperm.xlu0 (!%p2879_p0), %3266, %v902_v2   ;;  %v907_v10 = vand.u32 (!%p2879_p0), 127, %v906_v9  ;;  %vm1031_vm8 = vcmask (!%p2879_p0), 261120  }
  0x47   : > { %vm920_vm3 = vcmp.eq.s32.totalorder (!%p2879_p0), %v907_v10, 7  ;;  %vm935_vm4 = vcmp.eq.s32.totalorder (!%p2879_p0), %v907_v10, 8 }
  0x48   : > { %v2882_v16 = vsel (!%p2879_p0), %vm935_vm4, 1.0, %v3449_v14 }
  0x49   : > { %v940_v6 = vld [vmem:[%s4179_s21] sm:$0xff] (!%p2879_p0)  ;;  %v941_v7 = vld [vmem:[%s4179_s21 + $0x8] sm:$0x1] (!%p2879_p0)  ;;  %928 = vperm.xlu1 (!%p2879_p0), %3267, %v905_v4   ;;  %912 = vperm.xlu0 (!%p2879_p0), %3266, %v903_v5  }
  0x4a   : > { %v3163_v8 = vpack.c.bf16 (!%p2879_p0), %v941_v7, %v940_v6  ;;  %v1028_v25 = vld [vmem:[%s4180_s23] sm:$0xff] (!%p2879_p0) }
  0x4c   : > { %3165 = vmatprep.subr.msk.bf16.mxu0 %vm3164_vm2, %v3163_v8 }
  0x4d   : > { %3168 = vmatpush3.bf16.msk.msra.mxu0 %vm3164_vm2, %v3163_v8 }
  0xc4   : > { %v924_v11 = vpop.permute.xlu1 %923  ;;  %v910_v12 = vpop.permute.xlu0 %909 }
  0xc5   : > { %v931_v13 = vsel %vm920_vm3, %v924_v11, 0.0  ;;  %vm914_vm5 = vcmp.eq.s32.totalorder %v907_v10, %v910_v12 }
  0xc6   : > { %v2880_v15 = vsel %vm914_vm5, 1.0, %v3449_v14 }
  0xc7   : > { %v933_v17 = vadd.f32 %v2880_v15, %v931_v13 }
  0xc8   : > { %v929_v18 = vpop.permute.xlu1 %928  ;;  %v913_v19 = vpop.permute.xlu0 %912 }
  0xc9   : > { %v932_v20 = vsel %vm920_vm3, %v929_v18, 0.0  ;;  %vm915_vm7 = vcmp.eq.s32.totalorder %v907_v10, %v913_v19  ;;  %v938_v21 = vadd.f32 %v2882_v16, %v933_v17 }
  0xca   : > { %v2881_v22 = vsel %vm915_vm7, 1.0, %v3449_v14 }
  0xcb   : > { %v934_v23 = vadd.f32 %v2881_v22, %v932_v20  ;;  %3008 = vmatprep.mubr.msk.f32.mxu0 %vm942_vm6, %v938_v21 }
  0xcd   : > { %v939_v24 = vadd.f32 %v2882_v16, %v934_v23 }
  0xcf   : > { %3009 = vmatmul.mubr.msk.f32.vlgmr.msra.gmra.mrb[0].mxu0 %vm942_vm6, %v939_v24 }
 0x1a2   : > { %v3010_v26 = vpop.f32.mrb[0].mxu0 }
 0x1a3   : > { %v1030_v27 = vadd.f32 %v3010_v26, %v1028_v25  ;;  %v1019_v28 = vpop.f32.mrb[1].mxu0 }
 0x1a4   : > { %v1029_v29 = vadd.f32 %v1028_v25, %v1019_v28 }
 0x1a5   : > { %1033 = vst.msk [vmem:[#allocation2 + $0x8] sm:$0xff] %vm1031_vm8, %v1030_v27 }
 0x1a6   : > { %1032 = vst.msk [vmem:[#allocation2] sm:$0xff] %vm1031_vm8, %v1029_v29 }
 0x1a7 PF: > { %s4181_s25 = sld [smem:[#allocation19_spill]]  ;;  %v3450_v31 = vmov 0.0   ;;  %vm3451_vm9 = vmmov 0   ;;  %vm1085_vm10 = vcmask 261120   ;;  %s4182_s27 = scalar_lea.vmem %s4106_s6, %s3660_s1  ;;  %vm1135_vm11 = vcmask 64512  }
 0x1a8   : > { %3011 = vmatprep.subr.bf16.mxu0 %v3450_v31  ;;  %3019 = vmatprep.subr.bf16.mxu1 %v3450_v31  ;;  %v2886_v36 = vld [vmem:[%s4182_s27] ss:$0 sm:$0xff]  ;;  %s3452_s15 = smov 96   ;;  %s3453_s29 = smov 64   ;;  %vm1270_vm12 = vcmask 1043456   ;;  %v1042_v53 = vlaneseq  ;;  %vm1036_vm13 = vcmp.eq.s32.totalorder %v3672_v0, 0 }
 0x1a9   : > { %3015 = vmatprep.mubr.msk.bf16.mxu0 %vm3451_vm9, %v3450_v31  ;;  %3021 = vmatprep.mubr.msk.bf16.mxu1 %vm3451_vm9, %v3450_v31  ;;  %s3454_s24 = smov 88   ;;  %s3455_s7 = smov 120   ;;  %v3457_v51 = vmov 1966171168   ;;  %v1037_v57 = vsel %vm1036_vm13, -1e+30, %v3450_v31 }
 0x1aa   : > { %s3456_s19 = smov 56   ;;  %v1040_v52 = vunpack.c.l.s4 %v3457_v51  ;;  %v1043_v55 = vshrl.u32 %v1042_v53, 7  ;;  %s3458_s4 = smov 80   ;;  %vm2064_vm14 = vcmask 130048   ;;  %vm2067_vm15 = vcmask 195584  }
 0x1ab   : > { %s3459_s22 = smov 112   ;;  %s3460_s18 = smov 48   ;;  %vm2295_vm0 = vcmask 523264  }
 0x1ac   : > { %v3747_v34 = vld [vmem:[#allocation2 + $0x8] sm:$0xff]  ;;  %v1041_v54 = vunpack.c.0.s8 %v1040_v52  ;;  %v1235_v60 = vsub.s32 0, %v1043_v55  ;;  %s3461_s28 = smov 72   ;;  %s3462_s23 = smov 104  }
 0x1ad   : > { %v3283_v30 = vld [vmem:[%s4181_s25] sm:$0xff]   ;;  %v3284_v32 = vld [vmem:[%s4181_s25 + $0x8] sm:$0xff]   ;;  %s3463_s25 = smov 40   ;;  %s4183_s26 = sld [smem:[#allocation20_spill]] }
 0x1ae   : > { %3012 = vmatpush3.bf16.msra.mxu0 %v3283_v30  ;;  %v3745_v33 = vld [vmem:[#allocation2] sm:$0xff]  ;;  %v1044_v56 = vsub.s32 %v1041_v54, %v1043_v55  ;;  %s3464_s17 = smov 8   ;;  %s3465_s27 = smov 16  }
 0x1af   : > { %3013 = vmatprep.subr.bf16.mxu0 %v3450_v31  ;;  %v1061_v35 = vpack.c.bf16 %v3747_v34, %v3745_v33 }
 0x1b0   : > { %v1045_v58 = vrot.slane %v1037_v57, %v1044_v56 }
 0x1b2   : > { %3014 = vmatpush3.bf16.msra.mxu0 %v3284_v32  ;;  %v1053_v59 = vrot.slane %v1045_v58, %v1044_v56  ;;  %v1046_v61 = vcombine.high %v1045_v58, %v1045_v58 }
 0x1b3   : > { %3025 = vmatprep.subr.bf16.mxu0 %v3450_v31 }
 0x1b4   : > { %v3793_v62 = vrot.slane %v1053_v59, %v1235_v60  ;;  %v1060_v63 = vrot.slane %v1046_v61, %v1044_v56 }
 0x1b5   : > { %3016 = vmatmul.mubr.msk.bf16.vlgmr.msra.gmra.mrb[0].mxu0 %vm1085_vm10, %v1061_v35 }
 0x1b6   : > { %3027 = vmatprep.mubr.msk.bf16.mxu0 %vm3451_vm9, %v3450_v31  ;;  %v3796_v7 = vrot.slane %v1060_v63, %v1235_v60 }
 0x288   : > { %v1123_v37 = vpop.f32.mrb[0].mxu0 }
 0x289   : > { %v1124_v38 = vadd.f32 %v2886_v36, %v1123_v37  ;;  %v3017_v39 = vpop.f32.mrb[1].mxu0 }
 0x28a   : > { %v1126_v40 = vpop.f32.mrb[2].mxu0 }
 0x28b   : > { %v3763_v41 = vpack.c.bf16 %v1124_v38, %v1124_v38  ;;  %v1127_v42 = vadd.f32 %v2886_v36, %v1126_v40  ;;  %v3018_v43 = vpop.f32.mrb[3].mxu0 }
 0x28d   : > { %1133 = vrot.lane.b32.xlu0 %v3763_v41, %s3452_s15  ;;  %v3766_v44 = vpack.c.bf16 %v1127_v42, %v1127_v42 }
 0x291   : > { %1183 = vrot.lane.b32.xlu0 %v3766_v44, %s3452_s15  ;;  %s3466_s15 = smov 24  }
 0x295   : > { %1265 = vrot.lane.b32.xlu0 %v3763_v41, %s3453_s29 }
 0x299   : > { %1368 = vrot.lane.b32.xlu0 %v3763_v41, %s3454_s24 }
 0x29d   : > { %1418 = vrot.lane.b32.xlu0 %v3766_v44, %s3454_s24 }
 0x2a1   : > { %1366 = vrot.lane.b32.xlu0 %v3763_v41, %s3455_s7 }
 0x2a5   : > { %1416 = vrot.lane.b32.xlu0 %v3766_v44, %s3455_s7  ;;  %s4184_s7 = scalar_lea.vmem %s4108_s8, %s3660_s1 }
 0x2a9   : > { %1490 = vrot.lane.b32.xlu0 %v3763_v41, %s3456_s19 }
 0x2ff   : > { %v1134_v45 = vpop.permute.xlu0 %1133 }
 0x300   : > { %v1140_v46 = vsel %vm1135_vm11, %v1134_v45, 0 }
 0x301   : > { %3020 = vmatpush3.bf16.xpose.msra.mxu1 %v1140_v46 }
 0x302   : > { %3031 = vmatprep.subr.bf16.mxu1 %v3450_v31 }
 0x303   : > { %v1184_v47 = vpop.permute.xlu0 %1183 }
 0x304   : > { %v1189_v48 = vsel %vm1135_vm11, %v1184_v47, 0 }
 0x305   : > { %3026 = vmatpush3.bf16.xpose.msra.mxu0 %v1189_v48 }
 0x306   : > { %3037 = vmatprep.subr.bf16.mxu0 %v3450_v31 }
 0x307   : > { %v1266_v49 = vpop.permute.xlu0 %1265 }
 0x308   : > { %v1272_v50 = vsel %vm1270_vm12, %v1266_v49, 0  ;;  %3022 = vmatmul.mubr.msk.bf16.vlgmr.msra.gmra.mrb[0].mxu1 %vm1135_vm11, %v3763_v41 }
 0x309   : > { %3032 = vmatpush3.bf16.msra.mxu1 %v1272_v50  ;;  %3033 = vmatprep.mubr.msk.bf16.mxu1 %vm3451_vm9, %v3450_v31 }
 0x30a   : > { %3043 = vmatprep.subr.bf16.mxu1 %v3450_v31 }
 0x30b   : > { %v1369_v16 = vpop.permute.xlu0 %1368 }
 0x30c   : > { %3028 = vmatmul.mubr.msk.bf16.vlgmr.msra.gmra.mrb[4].mxu0 %vm1135_vm11, %v3766_v44  ;;  %v1374_v30 = vsel %vm1135_vm11, %v1369_v16, 0 }
 0x30d   : > { %3039 = vmatprep.mubr.msk.bf16.mxu0 %vm3451_vm9, %v3450_v31 }
 0x30f   : > { %v1419_v21 = vpop.permute.xlu0 %1418 }
 0x310   : > { %v1424_v36 = vsel %vm1135_vm11, %v1419_v21, 0 }
 0x313   : > { %v1367_v26 = vpop.permute.xlu0 %1366 }
 0x317   : > { %v1417_v29 = vpop.permute.xlu0 %1416 }
 0x31b   : > { %v1491_v37 = vpop.permute.xlu0 %1490 }
 0x31c   : > { %v1496_v38 = vsel %vm1270_vm12, %v1491_v37, 0 }
 0x3db   : > { %v1176_v1 = vpop.f32.mrb[0].mxu1 }
 0x3dc   : > { %v1231_v2 = vmul.f32 0.35355338, %v1176_v1  ;;  %v3023_v3 = vpop.f32.mrb[1].mxu1 }
 0x3dd   : > { %v1179_v4 = vpop.f32.mrb[2].mxu1 }
 0x3de   : > { %v3024_v5 = vpop.f32.mrb[3].mxu1  ;;  %v1243_v6 = vadd.f32 %v3793_v62, %v1231_v2 }
 0x3df   : > { %v1225_v8 = vpop.f32.mrb[4].mxu0 }
 0x3e0   : > { %v1232_v9 = vmul.f32 0.35355338, %v1225_v8  ;;  %v3029_v10 = vpop.f32.mrb[5].mxu0  ;;  %v1245_v11 = vsel %vm1135_vm11, %v1243_v6, -inf }
 0x3e1   : > { %1246 = vmax.xlane.f32.xlu1 %v1245_v11  ;;  %v1228_v12 = vpop.f32.mrb[6].mxu0 }
 0x3e2   : > { %v3030_v13 = vpop.f32.mrb[7].mxu0  ;;  %v1244_v14 = vadd.f32 %v3796_v7, %v1232_v9 }
 0x3e4   : > { %v1248_v15 = vsel %vm1135_vm11, %v1244_v14, -inf }
 0x3e5   : > { %1249 = vmax.xlane.f32.xlu1 %v1248_v15 }
 0x3f6   : > { %1314 = vrot.lane.b32.xlu1 %v3766_v44, %s3453_s29  ;;  %s4188_s29 = sld [smem:[#allocation9_spill]] }
 0x3fa   : > { %1538 = vrot.lane.b32.xlu1 %v3766_v44, %s3456_s19 }
 0x3fc   : > { %p2924_p1 = scmp.ne.s32.totalorder %s4188_s29, 1 }
 0x3fd   : > { %vm2392_vm1 = vcmp.ne.s32.totalorder (!%p2924_p1), %v3672_v0, 0  ;;  %vm2395_vm2 = vcmask (!%p2924_p1), 58368   ;;  %s4189_s24 = sld [smem:[#allocation29_spill]] (!%p2924_p1)  ;;  %vm3468_vm3 = vmmov (!%p2924_p1), 0   ;;  %vm2439_vm4 = vcmask (!%p2924_p1), 1041409   ;;  %s4192_s29 = sld [smem:[#allocation32_spill]] (!%p2924_p1) }
 0x3fe   : > { %vm2624_vm5 = vcmask (!%p2924_p1), 123968   ;;  %vm2630_vm6 = vcmask (!%p2924_p1), 189568  }
 0x403   : > { %v3334_v0 = vld [vmem:[%s4189_s24 + $0x8] sm:$0xff] (!%p2924_p1)  }
 0x46e   : > { %v1247_v17 = vpop.xlane.xlu1 %1246 }
 0x46f   : > { %v1251_v18 = vsub.f32 %v1243_v6, %v1247_v17 }
 0x471   : > { %v1253_v19 = vmul.f32 1.442695, %v1251_v18 }
 0x472   : > { %v1250_v20 = vpop.xlane.xlu1 %1249 }
 0x473   : > { %3293 = vpow2.f32 %v1253_v19  ;;  %v1252_v22 = vsub.f32 %v1244_v14, %v1250_v20 }
 0x475   : > { %v1255_v23 = vmul.f32 1.442695, %v1252_v22 }
 0x476   : > { %v1315_v24 = vpop.permute.xlu1 %1314 }
 0x477   : > { %3295 = vpow2.f32 %v1255_v23  ;;  %v1320_v25 = vsel %vm1270_vm12, %v1315_v24, 0 }
 0x478   : > { %3038 = vmatpush3.bf16.msra.mxu0 %v1320_v25 }
 0x479   : > { %3049 = vmatprep.subr.bf16.mxu0 %v3450_v31 }
 0x47a   : > { %v1539_v39 = vpop.permute.xlu1 %1538 }
 0x47b   : > { %v1544_v40 = vsel %vm1270_vm12, %v1539_v39, 0 }
 0x47d   : > { %v3807_v27 = vpop.eup %3293 }
 0x47e   : > { %v1263_v28 = vpack.c.bf16 %v3807_v27, %v3807_v27 }
 0x480   : > { %3034 = vmatmul.mubr.msk.bf16.vlgmr.msra.gmra.mrb[4].mxu1 %vm1135_vm11, %v1263_v28 }
 0x481   : > { %v3813_v32 = vpop.eup %3295  ;;  %3044 = vmatpush3.bf16.xpose.msra.mxu1 %v1374_v30  ;;  %3045 = vmatprep.mubr.msk.bf16.mxu1 %vm3451_vm9, %v3450_v31 }
 0x482   : > { %v1264_v35 = vpack.c.bf16 %v3813_v32, %v3813_v32  ;;  %3055 = vmatprep.subr.bf16.mxu1 %v3450_v31 }
 0x484   : > { %3040 = vmatmul.mubr.msk.bf16.vlgmr.msra.gmra.mrb[8].mxu0 %vm1135_vm11, %v1264_v35 }
 0x485   : > { %3050 = vmatpush3.bf16.xpose.msra.mxu0 %v1424_v36  ;;  %3051 = vmatprep.mubr.msk.bf16.mxu0 %vm3451_vm9, %v3450_v31 }
 0x486   : > { %3061 = vmatprep.subr.bf16.mxu0 %v3450_v31 }
 0x488   : > { %3046 = vmatmul.mubr.msk.bf16.vlgmr.msra.gmra.mrb[8].mxu1 %vm1135_vm11, %v1367_v26 }
 0x489   : > { %3056 = vmatpush3.bf16.msra.mxu1 %v1496_v38  ;;  %3057 = vmatprep.mubr.msk.bf16.mxu1 %vm3451_vm9, %v3450_v31 }
 0x48a   : > { %3067 = vmatprep.subr.bf16.mxu1 %v3450_v31 }
 0x48c   : > { %3052 = vmatmul.mubr.msk.bf16.vlgmr.msra.gmra.mrb[12].mxu0 %vm1135_vm11, %v1417_v29 }
 0x48d   : > { %3062 = vmatpush3.bf16.msra.mxu0 %v1544_v40  ;;  %3063 = vmatprep.mubr.msk.bf16.mxu0 %vm3451_vm9, %v3450_v31 }
 0x48e   : > { %3073 = vmatprep.subr.bf16.mxu0 %v3450_v31 }
 0x553   : > { %v3835_v42 = vpop.f32.mrb[4].mxu1 }
 0x554   : > { %v3035_v43 = vpop.f32.mrb[5].mxu1 }
 0x555   : > { %v1311_v45 = vpop.f32.mrb[6].mxu1 }
 0x556   : > { %v3036_v46 = vpop.f32.mrb[7].mxu1 }
 0x557   : > { %v3837_v47 = vpop.f32.mrb[8].mxu0 }
 0x558   : > { %v3041_v48 = vpop.f32.mrb[9].mxu0 }
 0x559   : > { %v1359_v49 = vpop.f32.mrb[10].mxu0 }
 0x55a   : > { %v3042_v50 = vpop.f32.mrb[11].mxu0 }
 0x55b   : > { %v1410_v51 = vpop.f32.mrb[8].mxu1 }
 0x55c   : > { %v1466_v52 = vmul.f32 0.35355338, %v1410_v51  ;;  %v3047_v53 = vpop.f32.mrb[9].mxu1 }
 0x55d   : > { %v1413_v54 = vpop.f32.mrb[10].mxu1 }
 0x55e   : > { %v3048_v55 = vpop.f32.mrb[11].mxu1  ;;  %v1468_v56 = vadd.f32 %v1466_v52, %v3793_v62 }
 0x55f   : > { %v1460_v57 = vpop.f32.mrb[12].mxu0 }
 0x560   : > { %v1467_v58 = vmul.f32 0.35355338, %v1460_v57  ;;  %v3053_v59 = vpop.f32.mrb[13].mxu0  ;;  %v1470_v60 = vsel %vm1135_vm11, %v1468_v56, -inf }
 0x561   : > { %1471 = vmax.xlane.f32.xlu1 %v1470_v60  ;;  %v1463_v61 = vpop.f32.mrb[14].mxu0 }
 0x562   : > { %v3054_v63 = vpop.f32.mrb[15].mxu0  ;;  %v1469_v1 = vadd.f32 %v1467_v58, %v3796_v7 }
 0x564   : > { %v1473_v2 = vsel %vm1135_vm11, %v1469_v1, -inf }
 0x565   : > { %1474 = vmax.xlane.f32.xlu0 %v1473_v2 }
 0x572   : > { %1592 = vrot.lane.b32.xlu1 %v3763_v41, %s3458_s4 }
 0x576   : > { %1590 = vrot.lane.b32.xlu1 %v3763_v41, %s3459_s22 }
 0x57a   : > { %1762 = vrot.lane.b32.xlu1 %v3766_v44, %s3460_s18 }
 0x57b   : > { %1642 = vrot.lane.b32.xlu0 %v3766_v44, %s3458_s4  ;;  %s4185_s4 = scalar_lea.vmem %s4109_s9, %s3660_s1 }
 0x57f   : > { %1640 = vrot.lane.b32.xlu0 %v3766_v44, %s3459_s22  ;;  %s4190_s22 = sld [smem:[#allocation31_spill]] (!%p2924_p1) }
 0x583   : > { %1714 = vrot.lane.b32.xlu0 %v3763_v41, %s3460_s18 }
 0x5ee   : > { %v1472_v3 = vpop.xlane.xlu1 %1471 }
 0x5ef   : > { %v1476_v4 = vsub.f32 %v1468_v56, %v1472_v3 }
 0x5f1   : > { %v1478_v5 = vmul.f32 1.442695, %v1476_v4 }
 0x5f2   : > { %v1475_v6 = vpop.xlane.xlu0 %1474  ;;  %v1593_v12 = vpop.permute.xlu1 %1592 }
 0x5f3   : > { %3297 = vpow2.f32 %v1478_v5  ;;  %v1477_v8 = vsub.f32 %v1469_v1, %v1475_v6  ;;  %v1598_v15 = vsel %vm1135_vm11, %v1593_v12, 0 }
 0x5f5   : > { %v1480_v9 = vmul.f32 1.442695, %v1477_v8 }
 0x5f6   : > { %v1643_v10 = vpop.permute.xlu0 %1642  ;;  %v1591_v18 = vpop.permute.xlu1 %1590 }
 0x5f7   : > { %3299 = vpow2.f32 %v1480_v9  ;;  %v1648_v19 = vsel %vm1135_vm11, %v1643_v10, 0 }
 0x5fa   : > { %v1641_v14 = vpop.permute.xlu0 %1640  ;;  %v1763_v22 = vpop.permute.xlu1 %1762 }
 0x5fb   : > { %v1768_v23 = vsel %vm1270_vm12, %v1763_v22, 0 }
 0x5fd   : > { %v3849_v11 = vpop.eup %3297 }
 0x5fe   : > { %v1488_v13 = vpack.c.bf16 %v3849_v11, %v3849_v11  ;;  %v1715_v20 = vpop.permute.xlu0 %1714 }
 0x5ff   : > { %v1720_v21 = vsel %vm1270_vm12, %v1715_v20, 0 }
 0x600   : > { %3058 = vmatmul.mubr.msk.bf16.vlgmr.msra.gmra.mrb[12].mxu1 %vm1135_vm11, %v1488_v13 }
 0x601   : > { %v3855_v16 = vpop.eup %3299  ;;  %3068 = vmatpush3.bf16.xpose.msra.mxu1 %v1598_v15  ;;  %3069 = vmatprep.mubr.msk.bf16.mxu1 %vm3451_vm9, %v3450_v31 }
 0x602   : > { %v1489_v17 = vpack.c.bf16 %v3855_v16, %v3855_v16  ;;  %3079 = vmatprep.subr.bf16.mxu1 %v3450_v31 }
 0x604   : > { %3064 = vmatmul.mubr.msk.bf16.vlgmr.msra.gmra.mrb[16].mxu0 %vm1135_vm11, %v1489_v17 }
 0x605   : > { %3074 = vmatpush3.bf16.xpose.msra.mxu0 %v1648_v19  ;;  %3075 = vmatprep.mubr.msk.bf16.mxu0 %vm3451_vm9, %v3450_v31 }
 0x606   : > { %3085 = vmatprep.subr.bf16.mxu0 %v3450_v31 }
 0x608   : > { %3070 = vmatmul.mubr.msk.bf16.vlgmr.msra.gmra.mrb[16].mxu1 %vm1135_vm11, %v1591_v18 }
 0x609   : > { %3080 = vmatpush3.bf16.msra.mxu1 %v1720_v21  ;;  %3081 = vmatprep.mubr.msk.bf16.mxu1 %vm3451_vm9, %v3450_v31 }
 0x60a   : > { %3091 = vmatprep.subr.bf16.mxu1 %v3450_v31 }
 0x60c   : > { %3076 = vmatmul.mubr.msk.bf16.vlgmr.msra.gmra.mrb[20].mxu0 %vm1135_vm11, %v1641_v14 }
 0x60d   : > { %3086 = vmatpush3.bf16.msra.mxu0 %v1768_v23  ;;  %3087 = vmatprep.mubr.msk.bf16.mxu0 %vm3451_vm9, %v3450_v31 }
 0x60e   : > { %3097 = vmatprep.subr.bf16.mxu0 %v3450_v31 }
 0x6d3   : > { %v3877_v24 = vpop.f32.mrb[12].mxu1 }
 0x6d4   : > { %v3059_v25 = vpop.f32.mrb[13].mxu1 }
 0x6d5   : > { %v1535_v26 = vpop.f32.mrb[14].mxu1 }
 0x6d6   : > { %v3060_v28 = vpop.f32.mrb[15].mxu1 }
 0x6d7   : > { %v3879_v29 = vpop.f32.mrb[16].mxu0 }
 0x6d8   : > { %v3065_v30 = vpop.f32.mrb[17].mxu0 }
 0x6d9   : > { %v1583_v35 = vpop.f32.mrb[18].mxu0 }
 0x6da   : > { %v3066_v36 = vpop.f32.mrb[19].mxu0 }
 0x6db   : > { %v1634_v37 = vpop.f32.mrb[16].mxu1 }
 0x6dc   : > { %v1690_v38 = vmul.f32 0.35355338, %v1634_v37  ;;  %v3071_v39 = vpop.f32.mrb[17].mxu1 }
 0x6dd   : > { %v1637_v40 = vpop.f32.mrb[18].mxu1 }
 0x6de   : > { %v3072_v43 = vpop.f32.mrb[19].mxu1  ;;  %v1692_v45 = vadd.f32 %v1690_v38, %v3793_v62 }
 0x6df   : > { %v1684_v46 = vpop.f32.mrb[20].mxu0 }
 0x6e0   : > { %v1691_v48 = vmul.f32 0.35355338, %v1684_v46  ;;  %v3077_v49 = vpop.f32.mrb[21].mxu0  ;;  %v1694_v50 = vsel %vm1135_vm11, %v1692_v45, -inf }
 0x6e1   : > { %1695 = vmax.xlane.f32.xlu1 %v1694_v50  ;;  %v1687_v51 = vpop.f32.mrb[22].mxu0 }
 0x6e2   : > { %v3078_v52 = vpop.f32.mrb[23].mxu0  ;;  %v1693_v53 = vadd.f32 %v1691_v48, %v3796_v7 }
 0x6e4   : > { %v1697_v54 = vsel %vm1135_vm11, %v1693_v53, -inf }
 0x6e5   : > { %1698 = vmax.xlane.f32.xlu0 %v1697_v54 }
 0x6f2   : > { %1816 = vrot.lane.b32.xlu1 %v3763_v41, %s3461_s28 }
 0x6f6   : > { %1814 = vrot.lane.b32.xlu1 %v3763_v41, %s3462_s23 }
 0x6fb   : > { %1866 = vrot.lane.b32.xlu0 %v3766_v44, %s3461_s28  ;;  %s4186_s28 = scalar_lea.vmem %s4110_s10, %s3660_s1 }
 0x6ff   : > { %1864 = vrot.lane.b32.xlu0 %v3766_v44, %s3462_s23 }
 0x76e   : > { %v1696_v55 = vpop.xlane.xlu1 %1695 }
 0x76f   : > { %v1700_v56 = vsub.f32 %v1692_v45, %v1696_v55  ;;  %v1485_v45 = vsel %vm1135_vm11, %v3855_v16, 0.0 }
 0x771   : > { %v1702_v57 = vmul.f32 1.442695, %v1700_v56 }
 0x772   : > { %v1699_v58 = vpop.xlane.xlu0 %1698  ;;  %v1817_v63 = vpop.permute.xlu1 %1816 }
 0x773   : > { %3301 = vpow2.f32 %v1702_v57  ;;  %v1701_v59 = vsub.f32 %v1693_v53, %v1699_v58  ;;  %v1822_v2 = vsel %vm1135_vm11, %v1817_v63, 0  ;;  %v1257_v57 = vsel %vm1135_vm11, %v3807_v27, 0.0 }
 0x775   : > { %v1704_v60 = vmul.f32 1.442695, %v1701_v59 }
 0x776   : > { %v1867_v4 = vpop.permute.xlu0 %1866  ;;  %v1815_v8 = vpop.permute.xlu1 %1814 }
 0x777   : > { %3303 = vpow2.f32 %v1704_v60  ;;  %v1872_v6 = vsel %vm1135_vm11, %v1867_v4, 0  ;;  %v1260_v60 = vsel %vm1135_vm11, %v3813_v32, 0.0 }
 0x77a   : > { %v1865_v9 = vpop.permute.xlu0 %1864 }
 0x77d   : > { %v3302_v61 = vpop.eup %3301 }
 0x77e   : > { %v1712_v1 = vpack.c.bf16 %v3302_v61, %v3302_v61 }
 0x780   : > { %3082 = vmatmul.mubr.msk.bf16.vlgmr.msra.gmra.mrb[20].mxu1 %vm1135_vm11, %v1712_v1 }
 0x781   : > { %v3304_v3 = vpop.eup %3303  ;;  %3092 = vmatpush3.bf16.xpose.msra.mxu1 %v1822_v2  ;;  %3093 = vmatprep.mubr.msk.bf16.mxu1 %vm3451_vm9, %v3450_v31 }
 0x782   : > { %v1713_v5 = vpack.c.bf16 %v3304_v3, %v3304_v3  ;;  %3103 = vmatprep.subr.bf16.mxu1 %v3450_v31  ;;  %v1709_v43 = vsel %vm1135_vm11, %v3304_v3, 0.0 }
 0x784   : > { %3088 = vmatmul.mubr.msk.bf16.vlgmr.msra.gmra.mrb[24].mxu0 %vm1135_vm11, %v1713_v5 }
 0x785   : > { %3098 = vmatpush3.bf16.xpose.msra.mxu0 %v1872_v6  ;;  %3099 = vmatprep.mubr.msk.bf16.mxu0 %vm3451_vm9, %v3450_v31 }
 0x786   : > { %3109 = vmatprep.subr.bf16.mxu0 %v3450_v31 }
 0x788   : > { %3094 = vmatmul.mubr.msk.bf16.vlgmr.msra.gmra.mrb[24].mxu1 %vm1135_vm11, %v1815_v8 }
 0x789   : > { %3105 = vmatprep.mubr.msk.bf16.mxu1 %vm3451_vm9, %v3450_v31 }
 0x78c   : > { %3100 = vmatmul.mubr.msk.bf16.vlgmr.msra.gmra.mrb[28].mxu0 %vm1135_vm11, %v1865_v9 }
 0x78d   : > { %3111 = vmatprep.mubr.msk.bf16.mxu0 %vm3451_vm9, %v3450_v31 }
 0x853   : > { %v3905_v10 = vpop.f32.mrb[20].mxu1 }
 0x854   : > { %v3083_v12 = vpop.f32.mrb[21].mxu1 }
 0x855   : > { %v1759_v13 = vpop.f32.mrb[22].mxu1 }
 0x856   : > { %v3084_v14 = vpop.f32.mrb[23].mxu1 }
 0x857   : > { %v3907_v15 = vpop.f32.mrb[24].mxu0  ;;  %v3285_v14 = vld [vmem:[%s4183_s26] sm:$0xff]  }
 0x858   : > { %v3089_v17 = vpop.f32.mrb[25].mxu0 }
 0x859   : > { %v1807_v18 = vpop.f32.mrb[26].mxu0 }
 0x85a   : > { %v3090_v19 = vpop.f32.mrb[27].mxu0 }
 0x85b   : > { %v1858_v20 = vpop.f32.mrb[24].mxu1 }
 0x85c   : > { %v1914_v21 = vmul.f32 0.35355338, %v1858_v20  ;;  %v3095_v22 = vpop.f32.mrb[25].mxu1 }
 0x85d   : > { %v1861_v23 = vpop.f32.mrb[26].mxu1 }
 0x85e   : > { %v3096_v25 = vpop.f32.mrb[27].mxu1  ;;  %v1916_v26 = vadd.f32 %v1914_v21, %v3793_v62  ;;  %v1482_v62 = vsel %vm1135_vm11, %v3849_v11, 0.0 }
 0x85f   : > { %v1908_v28 = vpop.f32.mrb[28].mxu0 }
 0x860   : > { %v1915_v30 = vmul.f32 0.35355338, %v1908_v28  ;;  %v3101_v35 = vpop.f32.mrb[29].mxu0  ;;  %v1918_v36 = vsel %vm1135_vm11, %v1916_v26, -inf }
 0x861   : > { %1919 = vmax.xlane.f32.xlu1 %v1918_v36  ;;  %v1911_v37 = vpop.f32.mrb[30].mxu0 }
 0x862   : > { %v3102_v38 = vpop.f32.mrb[31].mxu0  ;;  %v1917_v39 = vadd.f32 %v1915_v30, %v3796_v7  ;;  %v1706_v7 = vsel %vm1135_vm11, %v3302_v61, 0.0 }
 0x864   : > { %v1921_v40 = vsel %vm1135_vm11, %v1917_v39, -inf }
 0x865   : > { %1922 = vmax.xlane.f32.xlu0 %v1921_v40 }
 0x872   : > { %1986 = vrot.lane.b32.xlu1 %v3766_v44, %s3463_s25 }
 0x87b   : > { %1938 = vrot.lane.b32.xlu0 %v3763_v41, %s3463_s25 }
 0x896   : > { %1483 = vadd.xlane.f32.xlu1 %v1482_v62 }
 0x89a   : > { %1710 = vadd.xlane.f32.xlu1 %v1709_v43  ;;  %1486 = vadd.xlane.f32.xlu0 %v1485_v45 }
 0x89e   : > { %1707 = vadd.xlane.f32.xlu0 %v1706_v7 }
 0x8ee   : > { %v1920_v46 = vpop.xlane.xlu1 %1919 }
 0x8ef   : > { %v1924_v48 = vsub.f32 %v1916_v26, %v1920_v46 }
 0x8f1   : > { %v1926_v49 = vmul.f32 1.442695, %v1924_v48 }
 0x8f2   : > { %v1987_v44 = vpop.permute.xlu1 %1986  ;;  %v1923_v50 = vpop.xlane.xlu0 %1922 }
 0x8f3   : > { %3305 = vpow2.f32 %v1926_v49  ;;  %v1992_v41 = vsel %vm1270_vm12, %v1987_v44, 0  ;;  %v1925_v11 = vsub.f32 %v1917_v39, %v1923_v50 }
 0x8f4   : > { %3110 = vmatpush3.bf16.msra.mxu0 %v1992_v41 }
 0x8f5   : > { %v1928_v51 = vmul.f32 1.442695, %v1925_v11  ;;  %3123 = vmatprep.subr.bf16.mxu0 %v3450_v31 }
 0x8f6   : > { %v1939_v52 = vpop.permute.xlu0 %1938 }
 0x8f7   : > { %3307 = vpow2.f32 %v1928_v51  ;;  %v1944_v16 = vsel %vm1270_vm12, %v1939_v52, 0 }
 0x8f8   : > { %3104 = vmatpush3.bf16.msra.mxu1 %v1944_v16 }
 0x8f9   : > { %3115 = vmatprep.subr.bf16.mxu1 %v3450_v31 }
 0x8fd   : > { %v3306_v53 = vpop.eup %3305 }
 0x8fe   : > { %v1930_v54 = vsel %vm1135_vm11, %v3306_v53, 0.0  ;;  %v1936_v55 = vpack.c.bf16 %v3306_v53, %v3306_v53 }
 0x8ff   : > { %1931 = vadd.xlane.f32.xlu0 %v1930_v54 }
 0x900   : > { %3106 = vmatmul.mubr.msk.bf16.vlgmr.msra.gmra.mrb[28].mxu1 %vm1135_vm11, %v1936_v55 }
 0x901   : > { %v3308_v56 = vpop.eup %3307  ;;  %3119 = vmatprep.mubr.msk.bf16.mxu1 %vm3451_vm9, %v3450_v31  ;;  %3116 = vmatpush3.bf16.msra.mxu1 %v3285_v14  ;;  %v3289_v14 = vld [vmem:[%s3725_s20] sm:$0xff]  }
 0x902   : > { %v1933_v58 = vsel %vm1135_vm11, %v3308_v56, 0.0  ;;  %v1937_v59 = vpack.c.bf16 %v3308_v56, %v3308_v56  ;;  %3117 = vmatprep.subr.bf16.mxu1 %v3450_v31 }
 0x903   : > { %1258 = vadd.xlane.f32.xlu0 %v1257_v57  ;;  %1934 = vadd.xlane.f32.xlu1 %v1933_v58 }
 0x904   : > { %3112 = vmatmul.mubr.msk.bf16.vlgmr.msra.gmra.mrb[32].mxu0 %vm1135_vm11, %v1937_v59 }
 0x905   : > { %3127 = vmatprep.mubr.msk.bf16.mxu0 %vm3451_vm9, %v3450_v31 }
 0x907   : > { %1261 = vadd.xlane.f32.xlu1 %v1260_v60 }
 0x923   : > { %v1484_v61 = vpop.xlane.xlu1 %1483 }
 0x924   : > { %3309 = vrcp.f32 %v1484_v61 }
 0x927   : > { %v1711_v63 = vpop.xlane.xlu1 %1710  ;;  %v1487_v1 = vpop.xlane.xlu0 %1486 }
 0x928   : > { %3311 = vrcp.f32 %v1487_v1 }
 0x929   : > { %3313 = vrcp.f32 %v1711_v63 }
 0x92b   : > { %v1708_v27 = vpop.xlane.xlu0 %1707 }
 0x92c   : > { %3315 = vrcp.f32 %v1708_v27 }
 0x92e   : > { %v3310_v2 = vpop.eup %3309 }
 0x92f   : > { %v1588_v5 = vmul.f32 %v3310_v2, %v3877_v24 }
 0x932   : > { %v3312_v3 = vpop.eup %3311 }
 0x933   : > { %v3314_v4 = vpop.eup %3313  ;;  %v1589_v6 = vmul.f32 %v3312_v3, %v3879_v29  ;;  %v3286_v29 = vld [vmem:[%s4183_s26 + $0x8] sm:$0xff]  }
 0x934   : > { %v1813_v12 = vmul.f32 %v3314_v4, %v3907_v15  ;;  %3118 = vmatpush3.bf16.msra.mxu1 %v3286_v29 }
 0x935   : > { %v3268_v32 = vpack.i.bf16 %v1589_v6, %v1588_v5  ;;  %3131 = vmatprep.subr.bf16.mxu1 %v3450_v31 }
 0x936   : > { %v3316_v8 = vpop.eup %3315 }
 0x937   : > { %v1812_v9 = vmul.f32 %v3316_v8, %v3905_v10  ;;  %3269 = vrot.lane.b32.xlu0 %v3268_v32, %s3464_s17  ;;  %s4187_s17 = scalar_lea.vmem %s4111_s11, %s3660_s1  ;;  %s3469_s1 = smov (!%p2924_p1), 112  }
 0x939   : > { %v3273_v13 = vpack.i.bf16 %v1813_v12, %v1812_v9  ;;  %v3287_v12 = vld [vmem:[%s3711_s30] sm:$0xff]  }
 0x93a   : > { %3124 = vmatpush3.bf16.msra.mxu0 %v3287_v12 }
 0x93b   : > { %3274 = vrot.lane.b32.xlu1 %v3273_v13, %s3465_s27  ;;  %v3288_v13 = vld [vmem:[%s3711_s30 + $0x8] sm:$0xff]   ;;  %3125 = vmatprep.subr.bf16.mxu0 %v3450_v31  ;;  %s3472_s30 = smov (!%p2924_p1), 16  }
 0x93e   : > { %3126 = vmatpush3.bf16.msra.mxu0 %v3288_v13  ;;  %v2923_v13 = vld [vmem:[%s879_s0] ss:$0 sm:$0xff]  ;;  %s3470_s0 = smov (!%p2924_p1), 120  }
 0x98c   : > { %v1932_v17 = vpop.xlane.xlu0 %1931 }
 0x98d   : > { %3317 = vrcp.f32 %v1932_v17  ;;  %v3290_v17 = vld [vmem:[%s3725_s20 + $0x8] sm:$0xff]  }
 0x990   : > { %v1935_v24 = vpop.xlane.xlu1 %1934  ;;  %v1259_v36 = vpop.xlane.xlu0 %1258 }
 0x991   : > { %3319 = vrcp.f32 %v1935_v24 }
 0x992   : > { %3321 = vrcp.f32 %v1259_v36 }
 0x994   : > { %v1262_v37 = vpop.xlane.xlu1 %1261 }
 0x995   : > { %3323 = vrcp.f32 %v1262_v37 }
 0x997   : > { %v3318_v19 = vpop.eup %3317 }
 0x99b   : > { %v3320_v21 = vpop.eup %3319 }
 0x99c   : > { %v3322_v39 = vpop.eup %3321 }
 0x99d   : > { %v1364_v48 = vmul.f32 %v3322_v39, %v3835_v42  ;;  %v2906_v42 = vld [vmem:[%s4184_s7] ss:$0 sm:$0xff]  ;;  %v3292_v39 = vld [vmem:[%s3725_s20 + $0x18] sm:$0xff]   ;;  %s3471_s7 = smov (!%p2924_p1), 8  }
 0x99f   : > { %v3324_v62 = vpop.eup %3323 }
 0x9a0   : > { %v1365_v49 = vmul.f32 %v3324_v62, %v3837_v47 }
 0x9a9   : > { %v3270_v38 = vpop.permute.xlu0 %3269 }
 0x9aa   : > { %v3272_v43 = vunpack.i.h.bf16 %v3270_v38  ;;  %v3271_v45 = vunpack.i.l.bf16 %v3270_v38  ;;  %v3291_v38 = vld [vmem:[%s3725_s20 + $0x10] sm:$0xff]  }
 0x9ac   : > { %v2063_v50 = vsel %vm1135_vm11, %v1365_v49, %v3272_v43  ;;  %v2062_v41 = vsel %vm1135_vm11, %v1364_v48, %v3271_v45 }
 0x9ad   : > { %v3275_v40 = vpop.permute.xlu1 %3274 }
 0x9ae   : > { %v3277_v7 = vunpack.i.h.bf16 %v3275_v40  ;;  %v3276_v46 = vunpack.i.l.bf16 %v3275_v40  ;;  %v2912_v40 = vld [vmem:[%s887_s3] ss:$0 sm:$0xff] }
 0x9b0   : > { %v2065_v52 = vsel %vm2064_vm14, %v2062_v41, %v3276_v46  ;;  %v2066_v16 = vsel %vm2064_vm14, %v2063_v50, %v3277_v7 }
 0x9d3   : > { %v1980_v18 = vpop.f32.mrb[28].mxu1 }
 0x9d4   : > { %v3107_v10 = vpop.f32.mrb[29].mxu1  ;;  %v2036_v23 = vmul.f32 %v3318_v19, %v1980_v18 }
 0x9d5   : > { %v1983_v15 = vpop.f32.mrb[30].mxu1 }
 0x9d6   : > { %v3108_v20 = vpop.f32.mrb[31].mxu1 }
 0x9d7   : > { %v2028_v22 = vpop.f32.mrb[32].mxu0 }
 0x9d8   : > { %v2037_v25 = vmul.f32 %v3320_v21, %v2028_v22  ;;  %v3113_v26 = vpop.f32.mrb[33].mxu0  ;;  %v2910_v22 = vld [vmem:[%s4185_s4] ss:$0 sm:$0xff] }
 0x9d9   : > { %v2031_v28 = vpop.f32.mrb[34].mxu0 }
 0x9da   : > { %v3278_v30 = vpack.i.bf16 %v2037_v25, %v2036_v23  ;;  %v3114_v35 = vpop.f32.mrb[35].mxu0  ;;  %v2911_v28 = vld [vmem:[%s4186_s28] ss:$0 sm:$0xff] }
 0x9dc   : > { %3279 = vrot.lane.b32.xlu1 %v3278_v30, %s3466_s15 }
 0xa4e   : > { %v3280_v44 = vpop.permute.xlu1 %3279 }
 0xa4f   : > { %v3282_v11 = vunpack.i.h.bf16 %v3280_v44  ;;  %v3281_v51 = vunpack.i.l.bf16 %v3280_v44 }
 0xa51   : > { %v2069_v53 = vsel %vm2067_vm15, %v2066_v16, %v3282_v11  ;;  %v2068_v54 = vsel %vm2067_vm15, %v2065_v52, %v3281_v51 }
 0xa52   : > { %v2070_v55 = vpack.c.bf16 %v2069_v53, %v2068_v54 }
 0xa54   : > { %3120 = vmatmul.mubr.msk.bf16.vlgmr.msra.gmra.mrb[32].mxu1 %vm1085_vm10, %v2070_v55 }
 0xa55   : > { %3139 = vmatprep.mubr.msk.bf16.mxu1 %vm3451_vm9, %v3450_v31  ;;  %3132 = vmatpush3.bf16.msra.mxu1 %v3289_v14 }
 0xa56   : > { %3133 = vmatprep.subr.bf16.mxu1 %v3450_v31 }
 0xa59   : > { %3134 = vmatpush3.bf16.msra.mxu1 %v3290_v17 }
 0xa5a   : > { %3135 = vmatprep.subr.bf16.mxu1 %v3450_v31 }
 0xa5d   : > { %3136 = vmatpush3.bf16.msra.mxu1 %v3291_v38 }
 0xa5e   : > { %3137 = vmatprep.subr.bf16.mxu1 %v3450_v31  ;;  %v2916_v31 = vld [vmem:[%s895_s2] ss:$0 sm:$0xff] }
 0xa61   : > { %3138 = vmatpush3.bf16.msra.mxu1 %v3292_v39 }
 0xb27   : > { %v2131_v47 = vpop.f32.mrb[32].mxu1 }
 0xb28   : > { %v2132_v56 = vadd.f32 %v2906_v42, %v2131_v47  ;;  %v3121_v57 = vpop.f32.mrb[33].mxu1 }
 0xb29   : > { %v2134_v58 = vpop.f32.mrb[34].mxu1 }
 0xb2a   : > { %v2135_v59 = vadd.f32 %v2906_v42, %v2134_v58  ;;  %v3122_v60 = vpop.f32.mrb[35].mxu1  ;;  %v2138_v61 = vadd.f32 %v2132_v56, %v3745_v33 }
 0xb2c   : > { %v2142_v63 = vsel %vm1085_vm10, %v2138_v61, 0.0  ;;  %v2139_v1 = vadd.f32 %v2135_v59, %v3747_v34 }
 0xb2d   : > { %2143 = vadd.xlane.f32.xlu0 %v2142_v63 }
 0xb2e   : > { %v2145_v27 = vsel %vm1085_vm10, %v2139_v1, 0.0 }
 0xb2f   : > { %2146 = vadd.xlane.f32.xlu1 %v2145_v27 }
 0xbba   : > { %v2144_v2 = vpop.xlane.xlu0 %2143 }
 0xbbb   : > { %v2149_v3 = vmul.f32 0.03125, %v2144_v2 }
 0xbbc   : > { %v2147_v4 = vpop.xlane.xlu1 %2146 }
 0xbbd   : > { %v2151_v5 = vsub.f32 %v2138_v61, %v2149_v3  ;;  %v2150_v6 = vmul.f32 0.03125, %v2147_v4 }
 0xbbf   : > { %v2152_v8 = vsub.f32 %v2139_v1, %v2150_v6  ;;  %v2153_v32 = vmul.f32 %v2151_v5, %v2151_v5 }
 0xbc1   : > { %v2155_v33 = vsel %vm1085_vm10, %v2153_v32, 0.0  ;;  %v2154_v9 = vmul.f32 %v2152_v8, %v2152_v8 }
 0xbc2   : > { %2156 = vadd.xlane.f32.xlu0 %v2155_v33 }
 0xbc3   : > { %v2158_v34 = vsel %vm1085_vm10, %v2154_v9, 0.0  ;;  %v2922_v9 = vld [vmem:[%s4187_s17] ss:$0 sm:$0xff]  ;;  %s4191_s17 = sld [smem:[#allocation30_spill]] (!%p2924_p1) }
 0xbc6   : > { %2159 = vadd.xlane.f32.xlu0 %v2158_v34 }
 0xc4f   : > { %v2157_v24 = vpop.xlane.xlu0 %2156 }
 0xc50   : > { %v2161_v29 = vmul.f32 0.03125, %v2157_v24 }
 0xc52   : > { %v2163_v18 = vadd.f32 1e-05, %v2161_v29 }
 0xc53   : > { %v2160_v10 = vpop.xlane.xlu0 %2159 }
 0xc54   : > { %3325 = vrsqrt.f32 %v2163_v18  ;;  %v2162_v15 = vmul.f32 0.03125, %v2160_v10  ;;  %v3467_v10 = vmov (!%p2924_p1), 0.0  }
 0xc55   : > { %3143 = vmatprep.subr.bf16.mxu0 (!%p2924_p1), %v3467_v10  ;;  %3151 = vmatprep.subr.bf16.mxu1 (!%p2924_p1), %v3467_v10 }
 0xc56   : > { %v2164_v19 = vadd.f32 1e-05, %v2162_v15  ;;  %v2925_v15 = vsel (!%p2924_p1), %vm2392_vm1, 1.0, %v3467_v10 }
 0xc58   : > { %3327 = vrsqrt.f32 %v2164_v19  ;;  %v2396_v19 = vsel (!%p2924_p1), %vm2395_vm2, %v2925_v15, 0.0 }
 0xc5e   : > { %v3326_v20 = vpop.eup %3325 }
 0xc5f   : > { %v2167_v21 = vmul.f32 %v3326_v20, %v2151_v5  ;;  %v3333_v20 = vld [vmem:[%s4189_s24] sm:$0xff] (!%p2924_p1)  }
 0xc61   : > { %v2175_v25 = vmul.f32 %v2910_v22, %v2167_v21  ;;  %v3335_v21 = vld [vmem:[%s4190_s22] sm:$0xff] (!%p2924_p1)  }
 0xc62   : > { %v3328_v23 = vpop.eup %3327 }
 0xc63   : > { %v2168_v26 = vmul.f32 %v3328_v23, %v2152_v8  ;;  %v2183_v35 = vadd.f32 %v2911_v28, %v2175_v25 }
 0xc65   : > { %v2176_v30 = vmul.f32 %v2910_v22, %v2168_v26  ;;  %v3336_v22 = vld [vmem:[%s4190_s22 + $0x8] sm:$0xff] (!%p2924_p1)  }
 0xc67   : > { %v2184_v36 = vadd.f32 %v2911_v28, %v2176_v30 }
 0xc69   : > { %v2185_v37 = vpack.c.bf16 %v2184_v36, %v2183_v35 }
 0xc6b   : > { %3128 = vmatmul.mubr.msk.bf16.vlgmr.msra.gmra.mrb[36].mxu0 %vm1085_vm10, %v2185_v37 }
 0xc6c   : > { %3147 = vmatprep.mubr.msk.bf16.mxu0 (!%p2924_p1), %vm3468_vm3, %v3467_v10  ;;  %3144 = vmatpush3.bf16.msra.mxu0 (!%p2924_p1), %v3333_v20 }
 0xc6d   : > { %3145 = vmatprep.subr.bf16.mxu0 (!%p2924_p1), %v3467_v10 }
 0xc70   : > { %3146 = vmatpush3.bf16.msra.mxu0 (!%p2924_p1), %v3334_v0 }
 0xd3e   : > { %v2246_v62 = vpop.f32.mrb[36].mxu0 }
 0xd3f   : > { %v2247_v43 = vadd.f32 %v2912_v40, %v2246_v62  ;;  %v3129_v45 = vpop.f32.mrb[37].mxu0 }
 0xd40   : > { %v2249_v7 = vpop.f32.mrb[38].mxu0 }
 0xd41   : > { %v2250_v46 = vadd.f32 %v2912_v40, %v2249_v7  ;;  %v3130_v48 = vpop.f32.mrb[39].mxu0  ;;  %v2253_v49 = vmax.f32 %v2247_v43, 0.0 }
 0xd43   : > { %v2254_v44 = vmax.f32 %v2250_v46, 0.0 }
 0xd45   : > { %v2255_v50 = vpack.c.bf16 %v2254_v44, %v2253_v49 }
 0xd47   : > { %3140 = vmatmul.mubr.msk.bf16.vlgmr.msra.gmra.mrb[36].mxu1 %vm2295_vm0, %v2255_v50 }
 0xd48   : > { %3159 = vmatprep.mubr.msk.bf16.mxu1 (!%p2924_p1), %vm3468_vm3, %v3467_v10  ;;  %3152 = vmatpush3.bf16.msra.mxu1 (!%p2924_p1), %v3335_v21 }
 0xd49   : > { %3153 = vmatprep.subr.bf16.mxu1 (!%p2924_p1), %v3467_v10 }
 0xd4c   : > { %3154 = vmatpush3.bf16.msra.mxu1 (!%p2924_p1), %v3336_v22 }
 0xd4d   : > { %3155 = vmatprep.subr.bf16.mxu1 (!%p2924_p1), %v3467_v10 }
 0xe1a   : > { %v2333_v41 = vpop.f32.mrb[36].mxu1 }
 0xe1b   : > { %v2334_v11 = vadd.f32 %v2916_v31, %v2333_v41  ;;  %v3141_v51 = vpop.f32.mrb[37].mxu1 }
 0xe1c   : > { %v2336_v52 = vpop.f32.mrb[38].mxu1 }
 0xe1d   : > { %v2337_v16 = vadd.f32 %v2916_v31, %v2336_v52  ;;  %v3142_v53 = vpop.f32.mrb[39].mxu1  ;;  %v2340_v54 = vadd.f32 %v2334_v11, %v2183_v35 }
 0xe1f   : > { %v2344_v55 = vsel %vm1085_vm10, %v2340_v54, 0.0  ;;  %v2341_v42 = vadd.f32 %v2337_v16, %v2184_v36 }
 0xe20   : > { %2345 = vadd.xlane.f32.xlu1 %v2344_v55  ;;  %v3338_v55 = vld [vmem:[%s4190_s22 + $0x18] sm:$0xff] (!%p2924_p1)  }
 0xe21   : > { %v2347_v47 = vsel %vm1085_vm10, %v2341_v42, 0.0 }
 0xe22   : > { %2348 = vadd.xlane.f32.xlu0 %v2347_v47 }
 0xead   : > { %v2346_v56 = vpop.xlane.xlu1 %2345 }
 0xeae   : > { %v2350_v57 = vmul.f32 0.03125, %v2346_v56 }
 0xeaf   : > { %v2349_v58 = vpop.xlane.xlu0 %2348 }
 0xeb0   : > { %v2352_v59 = vsub.f32 %v2340_v54, %v2350_v57  ;;  %v2351_v60 = vmul.f32 0.03125, %v2349_v58  ;;  %v3337_v54 = vld [vmem:[%s4190_s22 + $0x10] sm:$0xff] (!%p2924_p1)  }
 0xeb1   : > { %3156 = vmatpush3.bf16.msra.mxu1 (!%p2924_p1), %v3337_v54 }
 0xeb2   : > { %v2353_v61 = vsub.f32 %v2341_v42, %v2351_v60  ;;  %v2354_v63 = vmul.f32 %v2352_v59, %v2352_v59  ;;  %3157 = vmatprep.subr.bf16.mxu1 (!%p2924_p1), %v3467_v10  ;;  %v2926_v42 = vld [vmem:[%s4191_s17] ss:$0 sm:$0xff] (!%p2924_p1) }
 0xeb4   : > { %v2356_v1 = vsel %vm1085_vm10, %v2354_v63, 0.0  ;;  %v2355_v27 = vmul.f32 %v2353_v61, %v2353_v61  ;;  %v2930_v63 = vld [vmem:[%s4192_s29] ss:$0 sm:$0xff] (!%p2924_p1) }
 0xeb5   : > { %2357 = vadd.xlane.f32.xlu1 %v2356_v1  ;;  %3158 = vmatpush3.bf16.msra.mxu1 (!%p2924_p1), %v3338_v55 }
 0xeb6   : > { %v2359_v2 = vsel %vm1085_vm10, %v2355_v27, 0.0 }
 0xeb7   : > { %2360 = vadd.xlane.f32.xlu0 %v2359_v2 }
 0xebb   : > { %2397 = vadd.xlane.f32.xlu0 (!%p2924_p1), %v2396_v19 }
 0xf42   : > { %v2358_v3 = vpop.xlane.xlu1 %2357 }
 0xf43   : > { %v2362_v4 = vmul.f32 0.03125, %v2358_v3 }
 0xf44   : > { %v2361_v5 = vpop.xlane.xlu0 %2360 }
 0xf45   : > { %v2364_v6 = vadd.f32 1e-05, %v2362_v4  ;;  %v2363_v8 = vmul.f32 0.03125, %v2361_v5 }
 0xf47   : > { %3329 = vrsqrt.f32 %v2364_v6  ;;  %v2365_v32 = vadd.f32 1e-05, %v2363_v8 }
 0xf48   : > { %v2398_v38 = vpop.xlane.xlu0 (!%p2924_p1), %2397 }
 0xf49   : > { %3331 = vrsqrt.f32 %v2365_v32  ;;  %v2414_v40 = vrot.slane (!%p2924_p1), %v2398_v38, 1 }
 0xf4a   : > { %3339 = vrcp.f32 (!%p2924_p1), %v2398_v38 }
 0xf4b   : > { %3341 = vrcp.f32 (!%p2924_p1), %v2414_v40 }
 0xf51   : > { %v3330_v33 = vpop.eup %3329 }
 0xf52   : > { %v2368_v34 = vmul.f32 %v3330_v33, %v2352_v59 }
 0xf53   : > { %v3332_v12 = vpop.eup %3331 }
 0xf54   : > { %v2376_v14 = vmul.f32 %v2922_v9, %v2368_v34  ;;  %v2369_v17 = vmul.f32 %v3332_v12, %v2353_v61  ;;  %2391 = sbr.rel (%p2924_p1) target bundleno = 4889 (0x1319), region = 112  ;;  %v3340_v48 = vpop.eup (!%p2924_p1), %3339 }
 0xf55   : > { %v3342_v44 = vpop.eup (!%p2924_p1), %3341 }
 0xf56   : > { %v2384_v24 = vadd.f32 %v2923_v13, %v2376_v14  ;;  %v2377_v29 = vmul.f32 %v2922_v9, %v2369_v17 }
 0xf58   : > { %2386 = vst.msk [vmem:[#allocation2] sm:$0xff] %vm1085_vm10, %v2384_v24  ;;  %v2385_v18 = vadd.f32 %v2923_v13, %v2377_v29  ;;  %v2399_v23 = vsel (!%p2924_p1), %vm1085_vm10, %v2384_v24, 0.0 }
 0xf59   : > { %v2400_v26 = vrot.slane (!%p2924_p1), %v2399_v23, 4 }
 0xf5a   : > { %2387 = vst.msk [vmem:[#allocation2 + $0x8] sm:$0xff] %vm1085_vm10, %v2385_v18  ;;  %v2406_v25 = vsel (!%p2924_p1), %vm1085_vm10, %v2385_v18, 0.0 }
 0xf5b   : > { %v2407_v28 = vrot.slane %v2406_v25, 4  ;;  %v2401_v30 = vadd.f32 %v2400_v26, %v2399_v23 }
 0xf5d   : > { %v2408_v35 = vadd.f32 %v2407_v28, %v2406_v25  ;;  %v2402_v36 = vrot.slane %v2401_v30, 2 }
 0xf5f   : > { %v2409_v37 = vrot.slane %v2408_v35, 2  ;;  %v2403_v39 = vadd.f32 %v2402_v36, %v2401_v30 }
 0xf61   : > { %v2410_v62 = vadd.f32 %v2409_v37, %v2408_v35  ;;  %v2404_v43 = vrot.slane %v2403_v39, 1 }
 0xf63   : > { %v2411_v45 = vrot.slane %v2410_v62, 1  ;;  %v2405_v7 = vadd.f32 %v2404_v43, %v2403_v39 }
 0xf65   : > { %v2412_v46 = vadd.f32 %v2411_v45, %v2410_v62  ;;  %v2418_v49 = vmul.f32 %v3340_v48, %v2405_v7 }
 0xf67   : > { %v2420_v50 = vmul.f32 %v3342_v44, %v2412_v46  ;;  %v2421_v31 = vpack.c.bf16 %v2418_v49, %v2418_v49 }
 0xf69   : > { %v2422_v41 = vpack.c.bf16 %v2420_v50, %v2420_v50  ;;  %v2436_v51 = vunpack.c.l.b16 %v2421_v31 }
 0xf6b   : > { %v2437_v11 = vunpack.c.l.b16 %v2422_v41 }
 0xf6d   : > { %v2438_v52 = vrot.slane %v2437_v11, 7 }
 0xf6f   : > { %v2440_v16 = vsel %vm2439_vm4, %v2438_v52, %v2436_v51 }
 0xf70   : > { %v2441_v53 = vpack.c.b16 %v2440_v16, %v2440_v16 }
 0xf72   : > { %3148 = vmatmul.mubr.msk.bf16.vlgmr.msra.gmra.mrb[0].mxu0 %vm1085_vm10, %v2441_v53 }
0x1045   : > { %v2491_v47 = vpop.f32.mrb[0].mxu0 }
0x1046   : > { %v2492_v56 = vadd.f32 %v2926_v42, %v2491_v47  ;;  %v3149_v57 = vpop.f32.mrb[1].mxu0 }
0x1047   : > { %v2494_v58 = vpop.f32.mrb[2].mxu0 }
0x1048   : > { %v2497_v59 = vmax.f32 %v2492_v56, 0.0  ;;  %v3150_v60 = vpop.f32.mrb[3].mxu0 }
0x104a   : > { %v2498_v61 = vpack.c.bf16 %v2497_v59, %v2497_v59 }
0x104c   : > { %3160 = vmatmul.mubr.msk.bf16.vlgmr.msra.gmra.mrb[0].mxu1 %vm2295_vm0, %v2498_v61 }
0x111f   : > { %v2575_v1 = vpop.f32.mrb[0].mxu1 }
0x1120   : > { %v2576_v27 = vadd.f32 %v2930_v63, %v2575_v1  ;;  %v3161_v2 = vpop.f32.mrb[1].mxu1 }
0x1121   : > { %v2578_v3 = vpop.f32.mrb[2].mxu1 }
0x1122   : > { %2586 = vrot.lane.b32.xlu1 %v2576_v27, %s3469_s1  ;;  %2582 = vrot.lane.b32.xlu0 %v2576_v27, %s3470_s0  ;;  %v3162_v4 = vpop.f32.mrb[3].mxu1 }
0x1194   : > { %v2583_v5 = vpop.permute.xlu0 %2582  ;;  %v2587_v8 = vpop.permute.xlu1 %2586 }
0x1195   : > { %v2585_v6 = vmax.f32 %v2576_v27, %v2583_v5 }
0x1197   : > { %v2589_v32 = vmax.f32 %v2585_v6, %v2587_v8 }
0x1199   : > { %2594 = vrot.lane.b32.xlu1 %v2589_v32, %s3471_s7  ;;  %v2590_v29 = vsub.f32 %v2576_v27, %v2589_v32 }
0x119b   : > { %v2591_v18 = vmul.f32 1.442695, %v2590_v29 }
0x119d   : > { %2600 = vrot.lane.b32.xlu1 %v2589_v32, %s3472_s30 }
0x120b   : > { %v2595_v33 = vpop.permute.xlu1 %2594 }
0x120c   : > { %v2597_v9 = vsub.f32 %v2576_v27, %v2595_v33 }
0x120e   : > { %v2598_v34 = vmul.f32 1.442695, %v2597_v9 }
0x120f   : > { %v2601_v12 = vpop.permute.xlu1 %2600 }
0x1210   : > { %3343 = vpow2.f32 %v2598_v34  ;;  %v2603_v13 = vsub.f32 %v2576_v27, %v2601_v12 }
0x1212   : > { %v2604_v14 = vmul.f32 1.442695, %v2603_v13 }
0x1214   : > { %3345 = vpow2.f32 %v2604_v14 }
0x1215   : > { %3347 = vpow2.f32 %v2591_v18 }
0x121a   : > { %v3344_v17 = vpop.eup %3343 }
0x121b   : > { %2607 = vrot.lane.b32.xlu1 %v3344_v17, %s3470_s0 }
0x121e   : > { %v3346_v24 = vpop.eup %3345 }
0x121f   : > { %2612 = vrot.lane.b32.xlu1 %v3346_v24, %s3469_s1  ;;  %v3348_v15 = vpop.eup %3347 }
0x128d   : > { %v2608_v10 = vpop.permute.xlu1 %2607 }
0x128e   : > { %v2610_v19 = vadd.f32 %v3348_v15, %v2608_v10 }
0x1291   : > { %v2613_v20 = vpop.permute.xlu1 %2612 }
0x1292   : > { %v2615_v0 = vadd.f32 %v2613_v20, %v2610_v19 }
0x1294   : > { %3349 = vrcp.f32 %v2615_v0 }
0x129e   : > { %v3350_v21 = vpop.eup %3349 }
0x129f   : > { %2620 = vrot.lane.b32.xlu1 %v3350_v21, %s3471_s7  ;;  %v2617_v22 = vmul.f32 %v3350_v21, %v3348_v15 }
0x12a1   : > { %2618 = vst.msk [vmem:[%s3727_s5] sm:$0x3] %vm2395_vm2, %v2617_v22 }
0x12a3   : > { %2626 = vrot.lane.b32.xlu1 %v3350_v21, %s3472_s30 }
0x1311   : > { %v2621_v23 = vpop.permute.xlu1 %2620 }
0x1312   : > { %v2623_v25 = vmul.f32 %v3344_v17, %v2621_v23 }
0x1314   : > { %2625 = vst.msk [vmem:[%s3727_s5] sm:$0x3] %vm2624_vm5, %v2623_v25 }
0x1315   : > { %v2627_v26 = vpop.permute.xlu1 %2626 }
0x1316   : > { %v2629_v28 = vmul.f32 %v3346_v24, %v2627_v26 }
0x1318   : > { %2631 = vst.msk [vmem:[%s3727_s5] sm:$0x3] %vm2630_vm6, %v2629_v28 }
0x1319 PF: > { %s4193_s19 = sld [smem:[#allocation10_spill]]  ;;  %s4194_s4 = sld [smem:[#allocation7_spill]] }
0x131a   : > { %s4196_s26 = sld [smem:[#allocation33_spill]]  ;;  %s2646_s3 = sshll.u32 %s3727_s5, 4  ;;  %s2647_s3 = int_to_ptr.vmem [resolvable:$true] %s2646_s3 }
0x131b   : > { %s3351_s15 = scalar_lea.vmem %s2647_s3, 32  ;;  %s3473_s29 = smov [#allocation3]  }
0x131c   : > { %p3352_p2 = scmp.ne.s32.totalorder %s2647_s3, %s3351_s15  ;;  %s3355_s1 = sshll.u32 %s3473_s29, 4  ;;  %s3356_s1 = int_to_ptr.vmem [resolvable:$false] %s3355_s1 }
0x131d   : > { %s3357_s0 = scalar_lea.vmem %s3356_s1, 64  ;;  %p3358_p6 = scmp.lt.s32.totalorder %s2647_s3, %s3356_s1 }
0x131e   : > { %p3353_p4 = pnand %p3352_p2, %p3633_p3  ;;  %p3359_p7 = scmp.lt.s32.totalorder %s3357_s0, %s3351_s15 }
0x131f   : > { %s2937_s28 = sshll.u32 %s4193_s19, 5  ;;  %s4198_s17 = sand.u32 1, %s4194_s4  }
0x1320   : > { %s4197_s20 = smov %s4196_s26  ;;  %s4050_s2 = scalar_lea.hbm %s4196_s26, %s2937_s28 }
0x1321   : > { %s2633_s27 = scalar_lea.sflag [#allocation4], %s4198_s17  ;;  %p3354_p5 = pneg %p3353_p4 }
0x1322   : > { %p3360_p8 = por %p3359_p7, %p3358_p6 }
0x1324   : > { %p3361_p10 = pnand %p3360_p8, %p3354_p5 }
0x1326   : > { %3364 = shalt.err (!%p3361_p10)
}
0x1327   : > { %s3365_s5 = scalar_lea.hbm %s4050_s2, 32  ;;  %s3369_s19 = scalar_lea.hbm %s4197_s20, 64 }
0x1328   : > { %p3366_p11 = scmp.ne.s32.totalorder %s4050_s2, %s3365_s5  ;;  %p3370_p0 = scmp.lt.u32.totalorder %s4050_s2, %s4197_s20 }
0x1329   : > { %p3371_p1 = scmp.lt.u32.totalorder %s3369_s19, %s3365_s5  ;;  %p3373_p4 = scmp.lt.u32.totalorder %s3365_s5, %s4050_s2 }
0x132a   : > { %p3367_p12 = pnand %p3366_p11, %p3633_p3 }
0x132b   : > { %p3372_p2 = por %p3371_p1, %p3370_p0 }
0x132c   : > { %p3368_p13 = pneg %p3367_p12 }
0x132d   : > { %p3374_p5 = por %p3373_p4, %p3372_p2 }
0x132f   : > { %p3375_p6 = pnand %p3374_p5, %p3368_p13 }
0x1331   : > { %3378 = shalt.err (!%p3375_p6)
}
0x1332   : > { %3169 = dma.vmem_to_hbm [thread:$0]  (%p3633_p3), %s2647_s3, 32, %s4050_s2, %s2633_s27  }
0x1333 PF: > { %s4199_s23 = sld [smem:[#allocation13_spill]]  ;;  %s4200_s25 = sld [smem:[#allocation6_spill]] }
0x1339   : > { %p3175_p7 = scmp.ge.s32.totalorder %s4199_s23, 2  ;;  %s2658_s17 = sand.u32 1, %s4200_s25  }
0x133a   : > { %s2659_s15 = scalar_lea.sflag [#allocation4], %s2658_s17 }
0x133b   : > { %p3172_p8 = pnand %p3175_p7, %p3643_p9 }
0x133d   : > { %3412 = dma.done.wait (!%p3172_p8), %s2659_s15, 32  }
0x133e   : > { %3414 = vsyncadd (!%p3172_p8), %s2659_s15, 4294967264  ;;  %s34_s0 = sadd.s32 1, %s4199_s23   ;;  %s4202_s2 = sld [smem:[#allocation7_spill]] }
0x133f   : > { %p31_p10 = scmp.ge.s32.totalorder %s34_s0, 6   ;;  %s4203_s25 = sld [smem:[#allocation8_spill]] }
0x1340   : > { %s4204_s26 = sld [smem:[#allocation18_spill]]  ;;  %s4205_s27 = sld [smem:[#allocation11_spill]] }
0x1341   : > { %s4206_s3 = sld [smem:[#allocation12_spill]]  ;;  %s4207_s28 = sld [smem:[#allocation14_spill]] }
0x1342   : > { %s4208_s29 = sld [smem:[#allocation16_spill]]  ;;  %33 = sbr.rel (!%p31_p10) target bundleno = 19 (0x13), region = 189 }
0x1349   :  { %2664 = vsyncpa [#allocation4], 1 }
0x134a   :  { %2666 = vsyncpa [#allocation4 + $0x1], 1 }

</bundles_post_ra>
